<compile_context>
chip_gen: v7x
topology: tpu7x:2x2x1
jax: 0.10.0
libtpu: 0.0.40
codegen_flags: <defaults>
</compile_context>

<pallas_src>
import numpy as np
import jax
import jax.numpy as jnp
from jax import lax
from jax.experimental import pallas as pl
from jax.experimental.pallas import tpu as pltpu


def _is_pow2(n):
    return n > 0 and (n & (n - 1)) == 0


# ----------------------------------------------------------------------------
# Fused kernel: 4 conv heads + dense ktdet_decode_fast, single pallas_call.
# ----------------------------------------------------------------------------
def make_fused_forward(H, W, C, Cmid, num_classes, kpt_thr, root_thr):
    assert num_classes == 1, "decode path assumes a single keypoint class"
    HW = H * W
    nc = num_classes
    NROW = ((2 * nc + 4 + 7) // 8) * 8     # head output rows, padded to 8
    NOUT = NROW + 8                        # + 8 decode rows (hnms/mask/root/align)
    M1 = 4 * Cmid                          # stage-1 output rows (4 heads)
    K1 = 9 * C                             # stage-1 contraction (9 taps x C)
    EPS = 1e-4

    def _row_col(shape):
        """(h, w) index maps for a (..., H*W) flattened layout."""
        p = lax.broadcasted_iota(jnp.int32, shape, len(shape) - 1)
        if _is_pow2(W):                    # avoid vector int div/rem
            return p >> (W.bit_length() - 1), p & (W - 1)
        return p // W, p % W

    def kernel(x_ref, w1_ref, w2_ref, out_ref, xs_ref):
        x = x_ref[...]                                         # (C, HW) f32

        # ---- hoisted boundary masks, computed once at (1, HW) --------------
        hrow, wcol = _row_col((1, HW))
        valid_h = {dh: (hrow + dh >= 0) & (hrow + dh < H) for dh in (-1, 0, 1)}
        valid_w = {dw: (wcol + dw >= 0) & (wcol + dw < W) for dw in (-1, 0, 1)}

        # ---- im2col: stream 9 shifted+masked taps into the bf16 scratch ----
        tap = 0
        for dh in (-1, 0, 1):
            for dw in (-1, 0, 1):
                s = dh * W + dw                                # tap[p] = x[p + s]
                if s == 0:
                    t = x
                else:
                    m = valid_h[dh] & valid_w[dw]              # (1,HW), bcast over C
                    t = jnp.where(m, pltpu.roll(x, (-s) % HW, 1), 0.0)
                xs_ref[pl.ds(tap * C, C), :] = t.astype(jnp.bfloat16)
                tap += 1
        # ones row at K1 (stage-1 bias column of w1 rides on it); rest zero pad
        pad_row = lax.broadcasted_iota(jnp.int32, (8, HW), 0)
        xs_ref[pl.ds(K1, 8), :] = jnp.where(pad_row == 0, 1.0, 0.0).astype(jnp.bfloat16)

        # ---- stage 1: four heads' 3x3 conv + bias + ReLU as ONE bf16 matmul
        h1 = jnp.dot(w1_ref[...], xs_ref[...],
                     preferred_element_type=jnp.float32)       # (M1+8, HW)
        h1 = jnp.maximum(h1, 0.0).astype(jnp.bfloat16)         # ones row stays 1.0

        # ---- stage 2: four heads' 1x1 conv + bias as ONE bf16 matmul --------
        y = jnp.dot(w2_ref[...], h1,
                    preferred_element_type=jnp.float32)        # (NROW, HW)
        row = lax.broadcasted_iota(jnp.int32, (NROW, HW), 0)
        y_sig = jnp.clip(jax.nn.sigmoid(y), EPS, 1.0 - EPS)
        y = jnp.where(row < 2 * nc, y_sig, y)                  # sigmoid on the 2 hms
        out_ref[pl.ds(0, NROW), :] = y                         # full-tile store #1

        # ---- dense ktdet_decode_fast straight from vregs --------------------
        heat = y[nc:nc + 1]                                    # keypts hm, class 0
        off_y = y[2 * nc + 1:2 * nc + 2]
        neg = jnp.float32(-jnp.inf)
        left = jnp.where(wcol == 0, neg, pltpu.roll(heat, 1, 1))            # heat[p-1]
        right = jnp.where(wcol == W - 1, neg, pltpu.roll(heat, HW - 1, 1))  # heat[p+1]
        hmax = jnp.maximum(jnp.maximum(left, right), heat)     # (1,3) max-pool
        hnms = heat * (hmax == heat).astype(jnp.float32)
        mask = jnp.logical_and(off_y < root_thr,
                               hnms > kpt_thr).astype(jnp.float32)
        xc = wcol.astype(jnp.float32)                          # coord_mat[..., 0]
        yc = hrow.astype(jnp.float32)                          # coord_mat[..., 1]
        coords = jnp.concatenate([xc, yc, xc, yc], axis=0)     # (4, HW)
        ra = y[2 * nc:2 * nc + 4] + coords      # root_x, root_y, align_x, align_y
        dec = jnp.concatenate(
            [hnms, mask, ra, jnp.zeros((2, HW), jnp.float32)], axis=0)  # (8, HW)
        out_ref[pl.ds(NROW, 8), :] = dec                       # full-tile store #2

    vspec = pl.BlockSpec(memory_space=pltpu.MemorySpace.VMEM)
    # TODO(synk): for production feature-map sizes add a 1-D grid over the HW
    # (lane) axis with dimension_semantics=("parallel",) so v7x's two
    # TensorCores split the lanes, plus a +/-W element halo on x for the
    # dh=+/-1 taps; size TILE_HW ~ 4-8K on v7x (64 MiB VMEM) and ~16K on
    # v5e/v6e (128 MiB).  At 16x16 one whole-in-VMEM block is optimal.
    return pl.pallas_call(
        kernel,
        out_shape=jax.ShapeDtypeStruct((NOUT, HW), jnp.float32),
        in_specs=[vspec, vspec, vspec],
        out_specs=vspec,
        scratch_shapes=[pltpu.VMEM((K1 + 8, HW), jnp.bfloat16)],
    )


# ----------------------------------------------------------------------------
# Parameters: per-head raw weights (for the reference check) + packed matrices
# with biases folded in as extra K columns (ones-row trick).
# ----------------------------------------------------------------------------
def init_params(key, Cin, Cmid, num_classes):
    heads_out = {'center': num_classes, 'keypts': num_classes, 'offset': 2, 'reg': 2}
    raw = {}
    for name, cout in heads_out.items():
        key, k1, k2, k3, k4 = jax.random.split(key, 5)
        w1 = jax.random.normal(k1, (3, 3, Cin, Cmid), jnp.float32) * 0.05
        b1 = jax.random.normal(k2, (Cmid,), jnp.float32) * 0.05
        w2 = jax.random.normal(k3, (Cmid, cout), jnp.float32) * 0.05
        b2 = jax.random.normal(k4, (cout,), jnp.float32) * 0.05
        raw[name] = (w1, b1, w2, b2)
    return raw


def pack_params(raw, Cin, Cmid, num_classes):
    order = ('center', 'keypts', 'offset', 'reg')
    NROW = ((2 * num_classes + 4 + 7) // 8) * 8
    M1 = len(order) * Cmid
    K1 = 9 * Cin
    w1_all = np.zeros((M1 + 8, K1 + 8), np.float32)          # +8: bias col + pad
    w2_all = np.zeros((NROW, M1 + 8), np.float32)            # block-diagonal + bias col
    row0 = 0
    for h, name in enumerate(order):
        w1, b1, w2, b2 = (np.asarray(t) for t in raw[name])
        cout = w2.shape[1]
        # rows = this head's Cmid channels, cols = tap*Cin + c (tap = ky*3+kx)
        w1_all[h * Cmid:(h + 1) * Cmid, :K1] = (
            w1.reshape(9, Cin, Cmid).transpose(2, 0, 1).reshape(Cmid, K1))
        w1_all[h * Cmid:(h + 1) * Cmid, K1] = b1              # stage-1 bias column
        w2_all[row0:row0 + cout, h * Cmid:(h + 1) * Cmid] = w2.T
        w2_all[row0:row0 + cout, M1] = b2                     # stage-2 bias column
        row0 += cout
    w1_all[M1, K1] = 1.0      # pass-through row: keeps the ones row alive for b2
    return (jnp.asarray(w1_all, dtype=jnp.bfloat16),
            jnp.asarray(w2_all, dtype=jnp.bfloat16))


# ----------------------------------------------------------------------------
# forward_test (upsample_num=0, aux_feat=None, 2-channel offsets -> fast decode).
# ----------------------------------------------------------------------------
def build_forward(H, W, C, num_classes, kpt_thr, root_thr):
    fused = make_fused_forward(H, W, C, C, num_classes, kpt_thr, root_thr)
    nc = num_classes
    NROW = ((2 * nc + 4 + 7) // 8) * 8

    @jax.jit
    def fwd(x_nchw, w1_all, w2_all):
        x_flat = x_nchw.reshape(C, H * W)                     # free reshape of NCHW
        out = fused(x_flat, w1_all, w2_all)                   # (NROW+8, H*W)
        return (out[0:nc].reshape(nc, H, W),                  # cpts_hm
                out[nc:2 * nc].reshape(nc, H, W),             # kpts_hm
                out[2 * nc:2 * nc + 2].reshape(2, H, W),      # pts_offset
                out[2 * nc + 2:2 * nc + 4].reshape(2, H, W),  # int_offset
                out[NROW].reshape(H, W),                      # heat_nms
                out[NROW + 1].reshape(H, W),                  # mask_low
                out[NROW + 2:NROW + 4].reshape(2, H, W),      # root_mat
                out[NROW + 4:NROW + 6].reshape(2, H, W))      # align_mat
    return fwd


def forward_test(x_list, packed, H, W, C, num_classes, kpt_thr, root_thr, hm_idx=0):
    # TODO(synk): upstream forward() passes hm_thr into the aux_feat slot (a bug
    # that would crash in PyTorch); we follow the intended aux_feat=None path.
    fwd = build_forward(H, W, C, num_classes, kpt_thr, root_thr)
    f_hm = x_list[hm_idx]                                     # (1, C, H, W) NCHW
    return fwd(f_hm, *packed)


def decode_postprocess(hnms, mask_low, root_mat, align_mat, kpt_thr):
    # Host-side dynamic-shape gathering (np.where + python loop in the reference).
    hnms = np.asarray(hnms)
    mask_low = np.asarray(mask_low)
    root = np.asarray(root_mat)
    align = np.asarray(align_mat)
    idx = np.where(mask_low.transpose(1, 0) > 0.5)            # (W, H) order like torch
    cpt_seeds = np.array(idx, dtype=int).transpose()
    ys, xs = np.where(hnms > kpt_thr)
    kpt_seeds = [(np.array([align[0, y, x], align[1, y, x]]),
                  np.array([root[0, y, x], root[1, y, x]], dtype=float))
                 for y, x in zip(ys, xs)]
    return cpt_seeds, kpt_seeds


# ----------------------------------------------------------------------------
# Pure references for correctness checks.
# ----------------------------------------------------------------------------
def head_ref(x_chw, w1, b1, w2, b2, apply_sigmoid):
    """float32 (HIGHEST) reference for one CtnetHead branch, returns (Cout,H,W)."""
    y = lax.conv_general_dilated(x_chw[None], w1, (1, 1), 'SAME',
                                 dimension_numbers=('NCHW', 'HWIO', 'NCHW'),
                                 precision=lax.Precision.HIGHEST)
    y = jnp.maximum(y + b1.reshape(1, -1, 1, 1), 0.0)
    y = jnp.einsum('nchw,cd->ndhw', y, w2,
                   precision=lax.Precision.HIGHEST) + b2.reshape(1, -1, 1, 1)
    if apply_sigmoid:
        y = jnp.clip(jax.nn.sigmoid(y), 1e-4, 1.0 - 1e-4)
    return y[0]


def decode_ref_np(kpts_hm, pts_offset, int_offset, kpt_thr, root_thr):
    """numpy reference for the dense part of ktdet_decode_fast."""
    heat = np.asarray(kpts_hm)[0]
    H, W = heat.shape
    pad = np.full((H, 1), -np.inf, np.float32)
    left = np.concatenate([pad, heat[:, :-1]], axis=1)
    right = np.concatenate([heat[:, 1:], pad], axis=1)
    hmax = np.maximum(np.maximum(left, right), heat)
    hnms = heat * (hmax == heat).astype(np.float32)
    off = np.asarray(pts_offset)
    err = np.asarray(int_offset)
    mask = np.logical_and(off[1] < root_thr, hnms > kpt_thr).astype(np.float32)
    xc, yc = np.meshgrid(np.arange(W, dtype=np.float32),
                         np.arange(H, dtype=np.float32))
    root = np.stack([xc + off[0], yc + off[1]])
    align = np.stack([xc + err[0], yc + err[1]])
    return hnms, mask, root, align


if __name__ == "__main__":
    key = jax.random.PRNGKey(0)
    N, C, H, W = 1, 32, 16, 16          # batch=1 (decode assumes a single image)
    num_classes = 1
    kpt_thr, root_thr = 0.4, 1.0

    k0, k1, kp = jax.random.split(key, 3)
    x0 = jax.random.normal(k0, (N, C, H, W), jnp.float32)
    x1 = jax.random.normal(k1, (N, C, H // 2, W // 2), jnp.float32)
    x_list = [x0, x1]                    # hm_idx = 0

    raw = init_params(kp, C, C, num_classes)
    packed = pack_params(raw, C, C, num_classes)

    outs = jax.block_until_ready(
        forward_test(x_list, packed, H, W, C, num_classes, kpt_thr, root_thr))
    (cpts_hm, kpts_hm, pts_offset, int_offset,
     hnms, mask_low, root_mat, align_mat) = outs

    cpt_seeds, kpt_seeds = decode_postprocess(hnms, mask_low, root_mat,
                                              align_mat, kpt_thr)

    # --- conv heads vs float32 XLA reference (kernel uses bf16 MXU -> loose tol) ---
    x_chw = x0[0]
    tol = dict(atol=5e-2, rtol=5e-2)
    assert np.allclose(np.asarray(cpts_hm),
                       np.asarray(head_ref(x_chw, *raw['center'], True)), **tol)
    assert np.allclose(np.asarray(kpts_hm),
                       np.asarray(head_ref(x_chw, *raw['keypts'], True)), **tol)
    assert np.allclose(np.asarray(pts_offset),
                       np.asarray(head_ref(x_chw, *raw['offset'], False)), **tol)
    assert np.allclose(np.asarray(int_offset),
                       np.asarray(head_ref(x_chw, *raw['reg'], False)), **tol)

    # --- decode dense part vs numpy reference on the kernel's own head outputs ---
    hnms_r, mask_r, root_r, align_r = decode_ref_np(kpts_hm, pts_offset, int_offset,
                                                    kpt_thr, root_thr)
    assert np.allclose(np.asarray(hnms), hnms_r, atol=1e-5)
    assert np.allclose(np.asarray(mask_low), mask_r, atol=1e-5)
    assert np.allclose(np.asarray(root_mat), root_r, atol=1e-5)
    assert np.allclose(np.asarray(align_mat), align_r, atol=1e-5)

    assert cpt_seeds.ndim == 2 or cpt_seeds.size == 0
    print("KERNEL_OK")
</pallas_src>

<mosaic_0001>
module attributes {stable_mosaic.version = 11 : i64} {
  func.func @kernel(%arg0: memref<32x256xf32, #tpu.memory_space<vmem>>, %arg1: memref<136x296xbf16, #tpu.memory_space<vmem>>, %arg2: memref<8x136xbf16, #tpu.memory_space<vmem>>, %arg3: memref<16x256xf32, #tpu.memory_space<vmem>>, %arg4: memref<296x256xbf16, #tpu.memory_space<vmem>>) attributes {dimension_semantics = [], scalar_prefetch = 0 : i64, scratch_operands = 1 : i64, tpu.core_type = #tpu.core_type<tc>} {
    %c0 = arith.constant 0 : index
    %c0_0 = arith.constant 0 : index
    %0 = vector.load %arg0[%c0, %c0_0] : memref<32x256xf32, #tpu.memory_space<vmem>>, vector<32x256xf32>
    %1 = tpu.iota {dimensions = array<i32: 1>} : vector<1x256xi32>
    %c4_i32 = arith.constant 4 : i32
    %2 = vector.broadcast %c4_i32 : i32 to vector<1x256xi32>
    %3 = arith.shrsi %1, %2 : vector<1x256xi32>
    %c15_i32 = arith.constant 15 : i32
    %4 = vector.broadcast %c15_i32 : i32 to vector<1x256xi32>
    %5 = arith.andi %1, %4 : vector<1x256xi32>
    %c-1_i32 = arith.constant -1 : i32
    %6 = vector.broadcast %c-1_i32 : i32 to vector<1x256xi32>
    %7 = arith.addi %3, %6 : vector<1x256xi32>
    %c0_i32 = arith.constant 0 : i32
    %8 = vector.broadcast %c0_i32 : i32 to vector<1x256xi32>
    %9 = arith.cmpi sge, %7, %8 : vector<1x256xi32>
    %c-1_i32_1 = arith.constant -1 : i32
    %10 = vector.broadcast %c-1_i32_1 : i32 to vector<1x256xi32>
    %11 = arith.addi %3, %10 : vector<1x256xi32>
    %c16_i32 = arith.constant 16 : i32
    %12 = vector.broadcast %c16_i32 : i32 to vector<1x256xi32>
    %13 = arith.cmpi slt, %11, %12 : vector<1x256xi32>
    %14 = arith.andi %9, %13 : vector<1x256xi1>
    %c0_i32_2 = arith.constant 0 : i32
    %15 = vector.broadcast %c0_i32_2 : i32 to vector<1x256xi32>
    %16 = arith.addi %3, %15 : vector<1x256xi32>
    %c0_i32_3 = arith.constant 0 : i32
    %17 = vector.broadcast %c0_i32_3 : i32 to vector<1x256xi32>
    %18 = arith.cmpi sge, %16, %17 : vector<1x256xi32>
    %c0_i32_4 = arith.constant 0 : i32
    %19 = vector.broadcast %c0_i32_4 : i32 to vector<1x256xi32>
    %20 = arith.addi %3, %19 : vector<1x256xi32>
    %c16_i32_5 = arith.constant 16 : i32
    %21 = vector.broadcast %c16_i32_5 : i32 to vector<1x256xi32>
    %22 = arith.cmpi slt, %20, %21 : vector<1x256xi32>
    %23 = arith.andi %18, %22 : vector<1x256xi1>
    %c1_i32 = arith.constant 1 : i32
    %24 = vector.broadcast %c1_i32 : i32 to vector<1x256xi32>
    %25 = arith.addi %3, %24 : vector<1x256xi32>
    %c0_i32_6 = arith.constant 0 : i32
    %26 = vector.broadcast %c0_i32_6 : i32 to vector<1x256xi32>
    %27 = arith.cmpi sge, %25, %26 : vector<1x256xi32>
    %c1_i32_7 = arith.constant 1 : i32
    %28 = vector.broadcast %c1_i32_7 : i32 to vector<1x256xi32>
    %29 = arith.addi %3, %28 : vector<1x256xi32>
    %c16_i32_8 = arith.constant 16 : i32
    %30 = vector.broadcast %c16_i32_8 : i32 to vector<1x256xi32>
    %31 = arith.cmpi slt, %29, %30 : vector<1x256xi32>
    %32 = arith.andi %27, %31 : vector<1x256xi1>
    %c-1_i32_9 = arith.constant -1 : i32
    %33 = vector.broadcast %c-1_i32_9 : i32 to vector<1x256xi32>
    %34 = arith.addi %5, %33 : vector<1x256xi32>
    %c0_i32_10 = arith.constant 0 : i32
    %35 = vector.broadcast %c0_i32_10 : i32 to vector<1x256xi32>
    %36 = arith.cmpi sge, %34, %35 : vector<1x256xi32>
    %c-1_i32_11 = arith.constant -1 : i32
    %37 = vector.broadcast %c-1_i32_11 : i32 to vector<1x256xi32>
    %38 = arith.addi %5, %37 : vector<1x256xi32>
    %c16_i32_12 = arith.constant 16 : i32
    %39 = vector.broadcast %c16_i32_12 : i32 to vector<1x256xi32>
    %40 = arith.cmpi slt, %38, %39 : vector<1x256xi32>
    %41 = arith.andi %36, %40 : vector<1x256xi1>
    %c0_i32_13 = arith.constant 0 : i32
    %42 = vector.broadcast %c0_i32_13 : i32 to vector<1x256xi32>
    %43 = arith.addi %5, %42 : vector<1x256xi32>
    %c0_i32_14 = arith.constant 0 : i32
    %44 = vector.broadcast %c0_i32_14 : i32 to vector<1x256xi32>
    %45 = arith.cmpi sge, %43, %44 : vector<1x256xi32>
    %c0_i32_15 = arith.constant 0 : i32
    %46 = vector.broadcast %c0_i32_15 : i32 to vector<1x256xi32>
    %47 = arith.addi %5, %46 : vector<1x256xi32>
    %c16_i32_16 = arith.constant 16 : i32
    %48 = vector.broadcast %c16_i32_16 : i32 to vector<1x256xi32>
    %49 = arith.cmpi slt, %47, %48 : vector<1x256xi32>
    %50 = arith.andi %45, %49 : vector<1x256xi1>
    %c1_i32_17 = arith.constant 1 : i32
    %51 = vector.broadcast %c1_i32_17 : i32 to vector<1x256xi32>
    %52 = arith.addi %5, %51 : vector<1x256xi32>
    %c0_i32_18 = arith.constant 0 : i32
    %53 = vector.broadcast %c0_i32_18 : i32 to vector<1x256xi32>
    %54 = arith.cmpi sge, %52, %53 : vector<1x256xi32>
    %c1_i32_19 = arith.constant 1 : i32
    %55 = vector.broadcast %c1_i32_19 : i32 to vector<1x256xi32>
    %56 = arith.addi %5, %55 : vector<1x256xi32>
    %c16_i32_20 = arith.constant 16 : i32
    %57 = vector.broadcast %c16_i32_20 : i32 to vector<1x256xi32>
    %58 = arith.cmpi slt, %56, %57 : vector<1x256xi32>
    %59 = arith.andi %54, %58 : vector<1x256xi1>
    %60 = arith.andi %14, %41 : vector<1x256xi1>
    %c17_i32 = arith.constant 17 : i32
    %61 = tpu.dynamic_rotate %0 by %c17_i32 dim 1 : vector<32x256xf32>, i32 -> vector<32x256xf32>
    %cst = arith.constant 0.000000e+00 : f32
    %62 = vector.shape_cast %60 : vector<1x256xi1> to vector<1x256xi1>
    %63 = vector.broadcast %62 : vector<1x256xi1> to vector<32x256xi1>
    %64 = vector.broadcast %cst : f32 to vector<32x256xf32>
    %65 = arith.select %63, %61, %64 : vector<32x256xi1>, vector<32x256xf32>
    %66 = arith.truncf %65 : vector<32x256xf32> to vector<32x256xbf16>
    %c0_21 = arith.constant 0 : index
    %c0_22 = arith.constant 0 : index
    %67 = vector.load %arg4[%c0_21, %c0_22] : memref<296x256xbf16, #tpu.memory_space<vmem>>, vector<32x256xbf16>
    tpu.vector_store %arg4[%c0_21, %c0_22], %66 {strides = array<i32>} : memref<296x256xbf16, #tpu.memory_space<vmem>>, vector<32x256xbf16>,
    %68 = arith.andi %14, %50 : vector<1x256xi1>
    %c16_i32_23 = arith.constant 16 : i32
    %69 = tpu.dynamic_rotate %0 by %c16_i32_23 dim 1 : vector<32x256xf32>, i32 -> vector<32x256xf32>
    %cst_24 = arith.constant 0.000000e+00 : f32
    %70 = vector.shape_cast %68 : vector<1x256xi1> to vector<1x256xi1>
    %71 = vector.broadcast %70 : vector<1x256xi1> to vector<32x256xi1>
    %72 = vector.broadcast %cst_24 : f32 to vector<32x256xf32>
    %73 = arith.select %71, %69, %72 : vector<32x256xi1>, vector<32x256xf32>
    %74 = arith.truncf %73 : vector<32x256xf32> to vector<32x256xbf16>
    %c32 = arith.constant 32 : index
    %c0_25 = arith.constant 0 : index
    %75 = vector.load %arg4[%c32, %c0_25] : memref<296x256xbf16, #tpu.memory_space<vmem>>, vector<32x256xbf16>
    tpu.vector_store %arg4[%c32, %c0_25], %74 {strides = array<i32>} : memref<296x256xbf16, #tpu.memory_space<vmem>>, vector<32x256xbf16>,
    %76 = arith.andi %14, %59 : vector<1x256xi1>
    %c15_i32_26 = arith.constant 15 : i32
    %77 = tpu.dynamic_rotate %0 by %c15_i32_26 dim 1 : vector<32x256xf32>, i32 -> vector<32x256xf32>
    %cst_27 = arith.constant 0.000000e+00 : f32
    %78 = vector.shape_cast %76 : vector<1x256xi1> to vector<1x256xi1>
    %79 = vector.broadcast %78 : vector<1x256xi1> to vector<32x256xi1>
    %80 = vector.broadcast %cst_27 : f32 to vector<32x256xf32>
    %81 = arith.select %79, %77, %80 : vector<32x256xi1>, vector<32x256xf32>
    %82 = arith.truncf %81 : vector<32x256xf32> to vector<32x256xbf16>
    %c64 = arith.constant 64 : index
    %c0_28 = arith.constant 0 : index
    %83 = vector.load %arg4[%c64, %c0_28] : memref<296x256xbf16, #tpu.memory_space<vmem>>, vector<32x256xbf16>
    tpu.vector_store %arg4[%c64, %c0_28], %82 {strides = array<i32>} : memref<296x256xbf16, #tpu.memory_space<vmem>>, vector<32x256xbf16>,
    %84 = arith.andi %23, %41 : vector<1x256xi1>
    %c1_i32_29 = arith.constant 1 : i32
    %85 = tpu.dynamic_rotate %0 by %c1_i32_29 dim 1 : vector<32x256xf32>, i32 -> vector<32x256xf32>
    %cst_30 = arith.constant 0.000000e+00 : f32
    %86 = vector.shape_cast %84 : vector<1x256xi1> to vector<1x256xi1>
    %87 = vector.broadcast %86 : vector<1x256xi1> to vector<32x256xi1>
    %88 = vector.broadcast %cst_30 : f32 to vector<32x256xf32>
    %89 = arith.select %87, %85, %88 : vector<32x256xi1>, vector<32x256xf32>
    %90 = arith.truncf %89 : vector<32x256xf32> to vector<32x256xbf16>
    %c96 = arith.constant 96 : index
    %c0_31 = arith.constant 0 : index
    %91 = vector.load %arg4[%c96, %c0_31] : memref<296x256xbf16, #tpu.memory_space<vmem>>, vector<32x256xbf16>
    tpu.vector_store %arg4[%c96, %c0_31], %90 {strides = array<i32>} : memref<296x256xbf16, #tpu.memory_space<vmem>>, vector<32x256xbf16>,
    %92 = arith.truncf %0 : vector<32x256xf32> to vector<32x256xbf16>
    %c128 = arith.constant 128 : index
    %c0_32 = arith.constant 0 : index
    %93 = vector.load %arg4[%c128, %c0_32] : memref<296x256xbf16, #tpu.memory_space<vmem>>, vector<32x256xbf16>
    tpu.vector_store %arg4[%c128, %c0_32], %92 {strides = array<i32>} : memref<296x256xbf16, #tpu.memory_space<vmem>>, vector<32x256xbf16>,
    %94 = arith.andi %23, %59 : vector<1x256xi1>
    %c255_i32 = arith.constant 255 : i32
    %95 = tpu.dynamic_rotate %0 by %c255_i32 dim 1 : vector<32x256xf32>, i32 -> vector<32x256xf32>
    %cst_33 = arith.constant 0.000000e+00 : f32
    %96 = vector.shape_cast %94 : vector<1x256xi1> to vector<1x256xi1>
    %97 = vector.broadcast %96 : vector<1x256xi1> to vector<32x256xi1>
    %98 = vector.broadcast %cst_33 : f32 to vector<32x256xf32>
    %99 = arith.select %97, %95, %98 : vector<32x256xi1>, vector<32x256xf32>
    %100 = arith.truncf %99 : vector<32x256xf32> to vector<32x256xbf16>
    %c160 = arith.constant 160 : index
    %c0_34 = arith.constant 0 : index
    %101 = vector.load %arg4[%c160, %c0_34] : memref<296x256xbf16, #tpu.memory_space<vmem>>, vector<32x256xbf16>
    tpu.vector_store %arg4[%c160, %c0_34], %100 {strides = array<i32>} : memref<296x256xbf16, #tpu.memory_space<vmem>>, vector<32x256xbf16>,
    %102 = arith.andi %32, %41 : vector<1x256xi1>
    %c241_i32 = arith.constant 241 : i32
    %103 = tpu.dynamic_rotate %0 by %c241_i32 dim 1 : vector<32x256xf32>, i32 -> vector<32x256xf32>
    %cst_35 = arith.constant 0.000000e+00 : f32
    %104 = vector.shape_cast %102 : vector<1x256xi1> to vector<1x256xi1>
    %105 = vector.broadcast %104 : vector<1x256xi1> to vector<32x256xi1>
    %106 = vector.broadcast %cst_35 : f32 to vector<32x256xf32>
    %107 = arith.select %105, %103, %106 : vector<32x256xi1>, vector<32x256xf32>
    %108 = arith.truncf %107 : vector<32x256xf32> to vector<32x256xbf16>
    %c192 = arith.constant 192 : index
    %c0_36 = arith.constant 0 : index
    %109 = vector.load %arg4[%c192, %c0_36] : memref<296x256xbf16, #tpu.memory_space<vmem>>, vector<32x256xbf16>
    tpu.vector_store %arg4[%c192, %c0_36], %108 {strides = array<i32>} : memref<296x256xbf16, #tpu.memory_space<vmem>>, vector<32x256xbf16>,
    %110 = arith.andi %32, %50 : vector<1x256xi1>
    %c240_i32 = arith.constant 240 : i32
    %111 = tpu.dynamic_rotate %0 by %c240_i32 dim 1 : vector<32x256xf32>, i32 -> vector<32x256xf32>
    %cst_37 = arith.constant 0.000000e+00 : f32
    %112 = vector.shape_cast %110 : vector<1x256xi1> to vector<1x256xi1>
    %113 = vector.broadcast %112 : vector<1x256xi1> to vector<32x256xi1>
    %114 = vector.broadcast %cst_37 : f32 to vector<32x256xf32>
    %115 = arith.select %113, %111, %114 : vector<32x256xi1>, vector<32x256xf32>
    %116 = arith.truncf %115 : vector<32x256xf32> to vector<32x256xbf16>
    %c224 = arith.constant 224 : index
    %c0_38 = arith.constant 0 : index
    %117 = vector.load %arg4[%c224, %c0_38] : memref<296x256xbf16, #tpu.memory_space<vmem>>, vector<32x256xbf16>
    tpu.vector_store %arg4[%c224, %c0_38], %116 {strides = array<i32>} : memref<296x256xbf16, #tpu.memory_space<vmem>>, vector<32x256xbf16>,
    %118 = arith.andi %32, %59 : vector<1x256xi1>
    %c239_i32 = arith.constant 239 : i32
    %119 = tpu.dynamic_rotate %0 by %c239_i32 dim 1 : vector<32x256xf32>, i32 -> vector<32x256xf32>
    %cst_39 = arith.constant 0.000000e+00 : f32
    %120 = vector.shape_cast %118 : vector<1x256xi1> to vector<1x256xi1>
    %121 = vector.broadcast %120 : vector<1x256xi1> to vector<32x256xi1>
    %122 = vector.broadcast %cst_39 : f32 to vector<32x256xf32>
    %123 = arith.select %121, %119, %122 : vector<32x256xi1>, vector<32x256xf32>
    %124 = arith.truncf %123 : vector<32x256xf32> to vector<32x256xbf16>
    %c256 = arith.constant 256 : index
    %c0_40 = arith.constant 0 : index
    %125 = vector.load %arg4[%c256, %c0_40] : memref<296x256xbf16, #tpu.memory_space<vmem>>, vector<32x256xbf16>
    tpu.vector_store %arg4[%c256, %c0_40], %124 {strides = array<i32>} : memref<296x256xbf16, #tpu.memory_space<vmem>>, vector<32x256xbf16>,
    %126 = tpu.iota {dimensions = array<i32: 0>} : vector<8x256xi32>
    %c0_i32_41 = arith.constant 0 : i32
    %127 = vector.broadcast %c0_i32_41 : i32 to vector<8x256xi32>
    %128 = arith.cmpi eq, %126, %127 : vector<8x256xi32>
    %cst_42 = arith.constant 1.000000e+00 : f32
    %cst_43 = arith.constant 0.000000e+00 : f32
    %129 = vector.broadcast %cst_42 : f32 to vector<8x256xf32>
    %130 = vector.broadcast %cst_43 : f32 to vector<8x256xf32>
    %131 = arith.select %128, %129, %130 : vector<8x256xi1>, vector<8x256xf32>
    %132 = arith.truncf %131 : vector<8x256xf32> to vector<8x256xbf16>
    %c288 = arith.constant 288 : index
    %c0_44 = arith.constant 0 : index
    %133 = vector.load %arg4[%c288, %c0_44] : memref<296x256xbf16, #tpu.memory_space<vmem>>, vector<8x256xbf16>
    tpu.vector_store %arg4[%c288, %c0_44], %132 {strides = array<i32>} : memref<296x256xbf16, #tpu.memory_space<vmem>>, vector<8x256xbf16>,
    %c0_45 = arith.constant 0 : index
    %c0_46 = arith.constant 0 : index
    %134 = vector.load %arg1[%c0_45, %c0_46] : memref<136x296xbf16, #tpu.memory_space<vmem>>, vector<136x296xbf16>
    %c0_47 = arith.constant 0 : index
    %c0_48 = arith.constant 0 : index
    %135 = vector.load %arg4[%c0_47, %c0_48] : memref<296x256xbf16, #tpu.memory_space<vmem>>, vector<296x256xbf16>
    %cst_49 = arith.constant dense<0.000000e+00> : vector<136x256xf32>
    %136 = tpu.matmul %134, %135, %cst_49 {dimension_numbers = #tpu.dot_dimension_numbers<[1], [0], [0], [1], [0, 0, 1, 1], [], []>} : vector<136x296xbf16>, vector<296x256xbf16>, vector<136x256xf32> -> vector<136x256xf32>
    %cst_50 = arith.constant 0.000000e+00 : f32
    %137 = vector.broadcast %cst_50 : f32 to vector<136x256xf32>
    %138 = arith.maximumf %136, %137 : vector<136x256xf32>
    %139 = arith.truncf %138 : vector<136x256xf32> to vector<136x256xbf16>
    %c0_51 = arith.constant 0 : index
    %c0_52 = arith.constant 0 : index
    %140 = vector.load %arg2[%c0_51, %c0_52] : memref<8x136xbf16, #tpu.memory_space<vmem>>, vector<8x136xbf16>
    %cst_53 = arith.constant dense<0.000000e+00> : vector<8x256xf32>
    %141 = tpu.matmul %140, %139, %cst_53 {dimension_numbers = #tpu.dot_dimension_numbers<[1], [0], [0], [1], [0, 0, 1, 1], [], []>} : vector<8x136xbf16>, vector<136x256xbf16>, vector<8x256xf32> -> vector<8x256xf32>
    %142 = tpu.iota {dimensions = array<i32: 0>} : vector<8x256xi32>
    %143 = arith.negf %141 : vector<8x256xf32>
    %144 = math.exp %143 : vector<8x256xf32>
    %cst_54 = arith.constant 1.000000e+00 : f32
    %145 = vector.broadcast %cst_54 : f32 to vector<8x256xf32>
    %146 = arith.addf %145, %144 : vector<8x256xf32>
    %147 = arith.divf %145, %146 : vector<8x256xf32>
    %cst_55 = arith.constant 9.99999974E-5 : f32
    %cst_56 = arith.constant 0.999899983 : f32
    %148 = vector.broadcast %cst_55 : f32 to vector<8x256xf32>
    %149 = arith.maximumf %148, %147 : vector<8x256xf32>
    %150 = vector.broadcast %cst_56 : f32 to vector<8x256xf32>
    %151 = arith.minimumf %150, %149 : vector<8x256xf32>
    %c2_i32 = arith.constant 2 : i32
    %152 = vector.broadcast %c2_i32 : i32 to vector<8x256xi32>
    %153 = arith.cmpi slt, %142, %152 : vector<8x256xi32>
    %154 = arith.select %153, %151, %141 : vector<8x256xi1>, vector<8x256xf32>
    %c0_57 = arith.constant 0 : index
    %c0_58 = arith.constant 0 : index
    %155 = vector.load %arg3[%c0_57, %c0_58] : memref<16x256xf32, #tpu.memory_space<vmem>>, vector<8x256xf32>
    tpu.vector_store %arg3[%c0_57, %c0_58], %154 {strides = array<i32>} : memref<16x256xf32, #tpu.memory_space<vmem>>, vector<8x256xf32>,
    %156 = vector.extract_strided_slice %154 {offsets = [1, 0], sizes = [1, 256], strides = [1, 1]} : vector<8x256xf32> to vector<1x256xf32>
    %157 = vector.extract_strided_slice %154 {offsets = [3, 0], sizes = [1, 256], strides = [1, 1]} : vector<8x256xf32> to vector<1x256xf32>
    %c0_i32_59 = arith.constant 0 : i32
    %158 = vector.broadcast %c0_i32_59 : i32 to vector<1x256xi32>
    %159 = arith.cmpi eq, %5, %158 : vector<1x256xi32>
    %c1_i32_60 = arith.constant 1 : i32
    %160 = tpu.dynamic_rotate %156 by %c1_i32_60 dim 1 : vector<1x256xf32>, i32 -> vector<1x256xf32>
    %cst_61 = arith.constant 0xFF800000 : f32
    %161 = vector.broadcast %cst_61 : f32 to vector<1x256xf32>
    %162 = arith.select %159, %161, %160 : vector<1x256xi1>, vector<1x256xf32>
    %c15_i32_62 = arith.constant 15 : i32
    %163 = vector.broadcast %c15_i32_62 : i32 to vector<1x256xi32>
    %164 = arith.cmpi eq, %5, %163 : vector<1x256xi32>
    %c255_i32_63 = arith.constant 255 : i32
    %165 = tpu.dynamic_rotate %156 by %c255_i32_63 dim 1 : vector<1x256xf32>, i32 -> vector<1x256xf32>
    %cst_64 = arith.constant 0xFF800000 : f32
    %166 = vector.broadcast %cst_64 : f32 to vector<1x256xf32>
    %167 = arith.select %164, %166, %165 : vector<1x256xi1>, vector<1x256xf32>
    %168 = arith.maximumf %162, %167 : vector<1x256xf32>
    %169 = arith.maximumf %168, %156 : vector<1x256xf32>
    %170 = arith.cmpf oeq, %169, %156 : vector<1x256xf32>
    %171 = arith.extui %170 : vector<1x256xi1> to vector<1x256xi32>
    %172 = arith.sitofp %171 : vector<1x256xi32> to vector<1x256xf32>
    %173 = arith.mulf %156, %172 : vector<1x256xf32>
    %cst_65 = arith.constant 1.000000e+00 : f32
    %174 = vector.broadcast %cst_65 : f32 to vector<1x256xf32>
    %175 = arith.cmpf olt, %157, %174 : vector<1x256xf32>
    %cst_66 = arith.constant 4.000000e-01 : f32
    %176 = vector.broadcast %cst_66 : f32 to vector<1x256xf32>
    %177 = arith.cmpf ogt, %173, %176 : vector<1x256xf32>
    %178 = arith.andi %175, %177 : vector<1x256xi1>
    %179 = arith.extui %178 : vector<1x256xi1> to vector<1x256xi32>
    %180 = arith.sitofp %179 : vector<1x256xi32> to vector<1x256xf32>
    %181 = arith.sitofp %5 : vector<1x256xi32> to vector<1x256xf32>
    %182 = arith.sitofp %3 : vector<1x256xi32> to vector<1x256xf32>
    %183 = tpu.concatenate %181, %182, %181, %182 in 0 : vector<1x256xf32>, vector<1x256xf32>, vector<1x256xf32>, vector<1x256xf32> -> vector<4x256xf32>
    %184 = vector.extract_strided_slice %154 {offsets = [2, 0], sizes = [4, 256], strides = [1, 1]} : vector<8x256xf32> to vector<4x256xf32>
    %185 = arith.addf %184, %183 : vector<4x256xf32>
    %cst_67 = arith.constant 0.000000e+00 : f32
    %186 = vector.broadcast %cst_67 : f32 to vector<2x256xf32>
    %187 = tpu.concatenate %173, %180, %185, %186 in 0 : vector<1x256xf32>, vector<1x256xf32>, vector<4x256xf32>, vector<2x256xf32> -> vector<8x256xf32>
    %c8 = arith.constant 8 : index
    %c0_68 = arith.constant 0 : index
    %188 = vector.load %arg3[%c8, %c0_68] : memref<16x256xf32, #tpu.memory_space<vmem>>, vector<8x256xf32>
    tpu.vector_store %arg3[%c8, %c0_68], %187 {strides = array<i32>} : memref<16x256xf32, #tpu.memory_space<vmem>>, vector<8x256xf32>,
    return
  }
}

</mosaic_0001>

<bundles_post_ra>
// kernel: squeeze.2
= control target key start
LH: loop header
LB: loop body
LE: loop exit
PB: predicated region body
PF: predicated region fallthrough
CT: control target
= control target key end

     0   :  { %s135_s0 = inlined_call_operand.vmem [shape: f32[256], index: 0, kind: input, shape index: {}]   ;;  %s136_s1 = inlined_call_operand.hbm [shape: f32[16,16], index: 1, kind: output, shape index: {}]  }
   0x1   :  { %v5_v0 = vld [vmem:[%s135_s0] sm:$0x3] }
   0x2   :  { %6 = vst [vmem:[#allocation2] sm:$0x3] %v5_v0 }
   0x3   :  { %2 = vsyncpa [#allocation1], 0  ;;  %s94_s0 = smov 112   ;;  %s95_s8 = smov 80   ;;  %vm8_vm0 = vcmask 130048  }
   0x4   :  { %s96_s9 = smov 96   ;;  %s97_s10 = smov 64  }
   0x5   :  { %s98_s11 = smov 48   ;;  %s99_s12 = smov 32  }
   0x6   :  { %s100_s13 = smov 16   ;;  %s101_s14 = smov [#allocation0]  }
   0x7   :  { %s56_s15 = sshll.u32 %s101_s14, 4  ;;  %s57_s15 = int_to_ptr.vmem [resolvable:$true] %s56_s15 }
   0x8   :  { %s70_s16 = scalar_lea.vmem %s57_s15, 256  ;;  %p75_p1 = scmp.lt.s32.totalorder %s57_s15, %s57_s15 }
   0x9   :  { %v10_v1 = vld [vmem:[#allocation2] sm:$0x3]   ;;  %p71_p0 = scmp.ne.s32.totalorder %s57_s15, %s70_s16  ;;  %p76_p2 = scmp.lt.s32.totalorder %s70_s16, %s70_s16 }
   0xa   :  { %v22_v2 = vld [vmem:[#allocation2] sm:$0x3]   ;;  %11 = vrot.lane.b32.xlu0 %v10_v1, %s94_s0 }
   0xb   :  { %23 = vrot.lane.b32.xlu1 %v22_v2, %s95_s8  ;;  %v16_v3 = vld [vmem:[#allocation2] sm:$0x3]   ;;  %p77_p3 = por %p76_p2, %p75_p1 }
   0xc   :  { %v28_v4 = vld [vmem:[#allocation2] sm:$0x3]  }
   0xd   :  { %v7_v5 = vld [vmem:[#allocation2] sm:$0x3]   ;;  %p78_p4 = pnand %p77_p3, %p71_p0 }
   0xe   :  { %9 = vst.msk [vmem:[#allocation0] ss:$8 sm:$0x3] %vm8_vm0, %v7_v5   ;;  %17 = vrot.lane.b32.xlu0 %v16_v3, %s96_s9  ;;  %v34_v6 = vld [vmem:[#allocation2] sm:$0x3]  }
   0xf   :  { %29 = vrot.lane.b32.xlu1 %v28_v4, %s97_s10  ;;  %v40_v7 = vld [vmem:[#allocation2] sm:$0x3]  }
  0x10   :  { %v46_v8 = vld [vmem:[#allocation2] sm:$0x3]  }
  0x12   :  { %35 = vrot.lane.b32.xlu0 %v34_v6, %s98_s11 }
  0x13   :  { %41 = vrot.lane.b32.xlu1 %v40_v7, %s99_s12 }
  0x16   :  { %47 = vrot.lane.b32.xlu0 %v46_v8, %s100_s13 }
  0x7c   :  { %v12_v9 = vpop.permute.xlu0 %11  }
  0x7d   :  { %v24_v10 = vpop.permute.xlu1 %23   ;;  %15 = vst.msk [vmem:[#allocation0 + $0x1] ss:$8 sm:$0x3] %vm8_vm0, %v12_v9  }
  0x7e   :  { %27 = vst.msk [vmem:[#allocation0 + $0x3] ss:$8 sm:$0x3] %vm8_vm0, %v24_v10  }
  0x80   :  { %v18_v11 = vpop.permute.xlu0 %17  }
  0x81   :  { %v30_v12 = vpop.permute.xlu1 %29   ;;  %21 = vst.msk [vmem:[#allocation0 + $0x2] ss:$8 sm:$0x3] %vm8_vm0, %v18_v11  }
  0x82   :  { %33 = vst.msk [vmem:[#allocation0 + $0x4] ss:$8 sm:$0x3] %vm8_vm0, %v30_v12  }
  0x84   :  { %v36_v13 = vpop.permute.xlu0 %35  }
  0x85   :  { %v42_v14 = vpop.permute.xlu1 %41   ;;  %39 = vst.msk [vmem:[#allocation0 + $0x5] ss:$8 sm:$0x3] %vm8_vm0, %v36_v13  }
  0x86   :  { %45 = vst.msk [vmem:[#allocation0 + $0x6] ss:$8 sm:$0x3] %vm8_vm0, %v42_v14  }
  0x88   :  { %v48_v15 = vpop.permute.xlu0 %47  }
  0x89   :  { %51 = vst.msk [vmem:[#allocation0 + $0x7] ss:$8 sm:$0x3] %vm8_vm0, %v48_v15  }
  0x8a   :  { %81 = shalt.err (!%p78_p4)
}
  0x8b   :  { %s82_s19 = scalar_lea.hbm %s136_s1, 256 }
  0x8c   :  { %p83_p5 = scmp.ne.s32.totalorder %s136_s1, %s82_s19  ;;  %p86_p6 = scmp.lt.u32.totalorder %s82_s19, %s136_s1 }
  0x8e   :  { %p88_p7 = pnand %p86_p6, %p83_p5 }
  0x90   :  { %91 = shalt.err (!%p88_p7)
}
  0x91   :  { %59 = dma.vmem_to_hbm [thread:$0]  %s57_s15, 256, %s136_s1, [#allocation1]  }
  0x92   :  { %92 = dma.done.wait [#allocation1], 256  }
  0x93   :  { %93 = vsyncadd [#allocation1], 4294967040 }
  0x94   :  { %61 = vsyncpa [#allocation1], 1 }

// kernel: fwd.1
= control target key start
LH: loop header
LB: loop body
LE: loop exit
PB: predicated region body
PF: predicated region fallthrough
CT: control target
= control target key end

     0   :  { %s2092_s28 = smov 17   ;;  %s2093_s29 = smov 16   ;;  %v2100_v16 = vmov 0   ;;  %v23_v18 = vlaneseq  ;;  %s2907_s0 = inlined_call_operand.vmem [shape: f32[32,256], index: 0, kind: input, shape index: {}]   ;;  %s2908_s1 = inlined_call_operand.vmem [shape: bf16[136,296], index: 1, kind: input, shape index: {}]   ;;  %s2909_s2 = inlined_call_operand.vmem [shape: bf16[8,136], index: 2, kind: input, shape index: {}]   ;;  %s2910_s3 = inlined_call_operand.vmem [shape: f32[16,256], index: 3, kind: output, shape index: {}]  }
   0x1   :  { %v2126_v0 = vld [vmem:[%s2907_s0 + $0x20] sm:$0xff]  ;;  %v2131_v1 = vld [vmem:[%s2907_s0 + $0x30] sm:$0xff]  ;;  %v2148_v5 = vld [vmem:[%s2907_s0 + $0x28] sm:$0xff]  ;;  %s2094_s30 = smov 15   ;;  %s2096_s4 = smov 127   ;;  %1227 = vmatprep.mubr.bf16.mxu1 %v2100_v16 }
   0x2   :  { %v2136_v2 = vld [vmem:[%s2907_s0] sm:$0xff]  ;;  %v1897_v3 = vpack.i.bf16 %v2131_v1, %v2126_v0  ;;  %v2143_v4 = vld [vmem:[%s2907_s0 + $0x10] sm:$0xff]  ;;  %v2153_v6 = vld [vmem:[%s2907_s0 + $0x38] sm:$0xff]  ;;  %v1728_v15 = vpack.c.bf16 %v2131_v1, %v2126_v0  ;;  %s2097_s5 = smov 113   ;;  %s2098_s6 = smov 111   ;;  %v2192_v19 = vand.u32 127, %v23_v18 }
   0x3   :  { %v1887_v7 = vpack.i.bf16 %v2143_v4, %v2136_v2  ;;  %v2160_v8 = vld [vmem:[%s2907_s0 + $0x8] sm:$0xff]  ;;  %v2165_v9 = vld [vmem:[%s2907_s0 + $0x18] sm:$0xff]  ;;  %v1902_v10 = vpack.i.bf16 %v2153_v6, %v2148_v5  ;;  %s2095_s0 = smov 1   ;;  %v1726_v13 = vpack.c.bf16 %v2143_v4, %v2136_v2  ;;  %v1729_v14 = vpack.c.bf16 %v2153_v6, %v2148_v5  ;;  %s2099_s7 = smov 112   ;;  %v2050_v17 = vld [vmem:[%s2908_s1 + $0x4] ss:$12 sps:$4 sm:$0xff]  }
   0x4   :  { %1898 = vrot.lane.b32.xlu1 %v1897_v3, %s2092_s28  ;;  %v1892_v11 = vpack.i.bf16 %v2165_v9, %v2160_v8  ;;  %v1727_v12 = vpack.c.bf16 %v2165_v9, %v2160_v8  ;;  %1106 = vmatprep.mubr.bf16.mxu0 %v2050_v17  ;;  %v25_v20 = vadd.s32 128, %v2192_v19  ;;  %v2198_v22 = vshra.s32 %v2192_v19, 4  ;;  %v2054_v2 = vld [vmem:[%s2908_s1 + $0x18] ss:$12 sps:$4 sm:$0xff]  }
   0x5   :  { %1888 = vrot.lane.b32.xlu0 %v1887_v7, %s2092_s28  ;;  %v2204_v25 = vand.u32 15, %v2192_v19  ;;  %vm92_vm8 = vcmp.lt.s32.totalorder %v2192_v19, 17  ;;  %vm159_vm10 = vcmp.lt.s32.totalorder %v2192_v19, 16  ;;  %vm226_vm15 = vcmp.lt.s32.totalorder %v2192_v19, 15 }
   0x6   :  { %v2195_v21 = vshra.s32 %v25_v20, 4  ;;  %v2200_v23 = vand.u32 15, %v25_v20  ;;  %v30_v26 = vadd.s32 4294967295, %v2198_v22 }
   0x7   :  { %v2211_v29 = vadd.s32 4294967295, %v2204_v25 }
   0x8   :  { %1903 = vrot.lane.b32.xlu1 %v1902_v10, %s2092_s28  ;;  %v31_v24 = vadd.s32 4294967295, %v2195_v21  ;;  %v2208_v27 = vadd.s32 4294967295, %v2200_v23  ;;  %vm32_vm2 = vcmp.ge.s32.totalorder %v30_v26, 0  ;;  %vm34_vm3 = vcmp.lt.s32.totalorder %v30_v26, 16 }
   0x9   :  { %1893 = vrot.lane.b32.xlu0 %v1892_v11, %s2092_s28  ;;  %vm2218_vm6 = vmand %vm32_vm2, %vm34_vm3  ;;  %vm54_vm7 = vcmp.ge.s32.totalorder %v2211_v29, 0  ;;  %v2267_v60 = vadd.s32 1, %v2200_v23 }
   0xa   :  { %vm33_vm0 = vcmp.ge.s32.totalorder %v31_v24, 0  ;;  %vm35_vm1 = vcmp.lt.s32.totalorder %v31_v24, 16  ;;  %vm55_vm5 = vcmp.ge.s32.totalorder %v2208_v27, 0  ;;  %vm2237_vm11 = vmand %vm2218_vm6, %vm54_vm7 }
   0xb   :  { %vm2213_vm4 = vmand %vm33_vm0, %vm35_vm1  ;;  %vm71_vm0 = vcmp.lt.s32.totalorder %v2267_v60, 16 }
   0xc   :  { %1913 = vrot.lane.b32.xlu1 %v1892_v11, %s2093_s29  ;;  %vm2228_vm9 = vmand %vm2213_vm4, %vm55_vm5 }
   0xd   :  { %1908 = vrot.lane.b32.xlu0 %v1887_v7, %s2093_s29  ;;  %vm1746_vm12 = vmpackc.low %vm2228_vm9, %vm2228_vm9  ;;  %vm41_vm9 = vcmp.lt.s32.totalorder %v2195_v21, 16 }
   0xe   :  { %vm1749_vm13 = vmpackc.low %vm2237_vm11, %vm2237_vm11  ;;  %vm2911_vm11 = vcmp.lt.s32.totalorder %v2192_v19, 1 }
   0xf   :  { %vm1758_vm14 = vmpackc.low %vm2213_vm4, %vm2213_vm4 }
  0x10   :  { %1923 = vrot.lane.b32.xlu1 %v1902_v10, %s2093_s29  ;;  %vm1761_vm1 = vmpackc.low %vm2218_vm6, %vm2218_vm6 }
  0x11   :  { %1918 = vrot.lane.b32.xlu0 %v1897_v3, %s2093_s29  ;;  %vm2322_vm2 = vmand %vm2213_vm4, %vm71_vm0 }
  0x14   :  { %1933 = vrot.lane.b32.xlu1 %v1892_v11, %s2094_s30 }
  0x15   :  { %1928 = vrot.lane.b32.xlu0 %v1887_v7, %s2094_s30 }
  0x18   :  { %1943 = vrot.lane.b32.xlu1 %v1902_v10, %s2094_s30 }
  0x19   :  { %1938 = vrot.lane.b32.xlu0 %v1897_v3, %s2094_s30 }
  0x1c   :  { %1953 = vrot.lane.b32.xlu1 %v1892_v11, %s2095_s0 }
  0x1d   :  { %1948 = vrot.lane.b32.xlu0 %v1887_v7, %s2095_s0 }
  0x20   :  { %1963 = vrot.lane.b32.xlu1 %v1902_v10, %s2095_s0 }
  0x21   :  { %1958 = vrot.lane.b32.xlu0 %v1897_v3, %s2095_s0 }
  0x24   :  { %1973 = vrot.lane.b32.xlu1 %v1892_v11, %s2096_s4 }
  0x25   :  { %1968 = vrot.lane.b32.xlu0 %v1887_v7, %s2096_s4 }
  0x28   :  { %1983 = vrot.lane.b32.xlu1 %v1902_v10, %s2096_s4 }
  0x29   :  { %1978 = vrot.lane.b32.xlu0 %v1897_v3, %s2096_s4 }
  0x2c   :  { %1993 = vrot.lane.b32.xlu1 %v1892_v11, %s2097_s5 }
  0x2d   :  { %1988 = vrot.lane.b32.xlu0 %v1887_v7, %s2097_s5 }
  0x30   :  { %2003 = vrot.lane.b32.xlu1 %v1902_v10, %s2097_s5 }
  0x31   :  { %1998 = vrot.lane.b32.xlu0 %v1897_v3, %s2097_s5 }
  0x34   :  { %2013 = vrot.lane.b32.xlu1 %v1892_v11, %s2098_s6 }
  0x35   :  { %2008 = vrot.lane.b32.xlu0 %v1887_v7, %s2098_s6 }
  0x38   :  { %2023 = vrot.lane.b32.xlu1 %v1892_v11, %s2099_s7 }
  0x39   :  { %2018 = vrot.lane.b32.xlu0 %v1887_v7, %s2099_s7 }
  0x3c   :  { %2033 = vrot.lane.b32.xlu1 %v1902_v10, %s2098_s6 }
  0x3d   :  { %2028 = vrot.lane.b32.xlu0 %v1897_v3, %s2098_s6 }
  0x40   :  { %2043 = vrot.lane.b32.xlu1 %v1902_v10, %s2099_s7 }
  0x41   :  { %2038 = vrot.lane.b32.xlu0 %v1897_v3, %s2099_s7 }
  0x76   :  { %v1899_v28 = vpop.permute.xlu1 %1898 }
  0x77   :  { %v1889_v30 = vpop.permute.xlu0 %1888  ;;  %v1901_v32 = vunpack.i.h.bf16 %v1899_v28  ;;  %v1900_v33 = vunpack.i.l.bf16 %v1899_v28 }
  0x78   :  { %v1891_v40 = vunpack.i.h.bf16 %v1889_v30  ;;  %v1890_v41 = vunpack.i.l.bf16 %v1889_v30 }
  0x7a   :  { %v1904_v34 = vpop.permute.xlu1 %1903 }
  0x7b   :  { %v1906_v36 = vunpack.i.h.bf16 %v1904_v34  ;;  %v1905_v37 = vunpack.i.l.bf16 %v1904_v34  ;;  %v1894_v38 = vpop.permute.xlu0 %1893 }
  0x7c   :  { %v1896_v42 = vunpack.i.h.bf16 %v1894_v38  ;;  %v1895_v43 = vunpack.i.l.bf16 %v1894_v38 }
  0x7d   :  { %v95_v45 = vsel %vm92_vm8, %v1900_v33, %v1905_v37  ;;  %v96_v46 = vsel %vm92_vm8, %v1901_v32, %v1906_v36  ;;  %v99_v58 = vsel %vm92_vm8, %v1905_v37, %v1900_v33  ;;  %v100_v61 = vsel %vm92_vm8, %v1906_v36, %v1901_v32 }
  0x7e   :  { %v1914_v47 = vpop.permute.xlu1 %1913  ;;  %v93_v48 = vsel %vm92_vm8, %v1890_v41, %v1895_v43  ;;  %v94_v49 = vsel %vm92_vm8, %v1891_v40, %v1896_v42  ;;  %v97_v54 = vsel %vm92_vm8, %v1895_v43, %v1890_v41  ;;  %v98_v57 = vsel %vm92_vm8, %v1896_v42, %v1891_v40 }
  0x7f   :  { %v1916_v50 = vunpack.i.h.bf16 %v1914_v47  ;;  %v1915_v51 = vunpack.i.l.bf16 %v1914_v47  ;;  %v1909_v52 = vpop.permute.xlu0 %1908  ;;  %v1747_v53 = vpack.c.bf16 %v94_v49, %v93_v48  ;;  %v1750_v59 = vpack.c.bf16 %v98_v57, %v97_v54 }
  0x80   :  { %v1911_v55 = vunpack.i.h.bf16 %v1909_v52  ;;  %v1910_v56 = vunpack.i.l.bf16 %v1909_v52  ;;  %v1753_v62 = vpack.c.bf16 %v96_v46, %v95_v45  ;;  %v1756_v32 = vpack.c.bf16 %v100_v61, %v99_v58 }
  0x81   :  { %1748 = vmatprep.subr.msk.bf16.mxu0 %vm1746_vm12, %v1747_v53  ;;  %v2293_v33 = vadd.s32 1, %v2204_v25  ;;  %vm39_vm8 = vcmp.ge.s32.totalorder %v2195_v21, 0 }
  0x82   :  { %v161_v63 = vsel %vm159_vm10, %v1911_v55, %v1916_v50  ;;  %v160_v3 = vsel %vm159_vm10, %v1910_v56, %v1915_v51  ;;  %v1924_v7 = vpop.permute.xlu1 %1923  ;;  %v165_v10 = vsel %vm159_vm10, %v1916_v50, %v1911_v55  ;;  %1751 = vmatpush1.bf16.msk.msra.mxu0 %vm1749_vm13, %v1750_v59  ;;  %v164_v24 = vsel %vm159_vm10, %v1915_v51, %v1910_v56  ;;  %vm2367_vm4 = vmand %vm39_vm8, %vm41_vm9 }
  0x83   :  { %v1926_v11 = vunpack.i.h.bf16 %v1924_v7  ;;  %v1925_v17 = vunpack.i.l.bf16 %v1924_v7  ;;  %v1919_v20 = vpop.permute.xlu0 %1918  ;;  %v1759_v26 = vpack.c.bf16 %v161_v63, %v160_v3  ;;  %1754 = vmatprep.subr.msk.bf16.mxu0 %vm1746_vm12, %v1753_v62  ;;  %v1762_v38 = vpack.c.bf16 %v165_v10, %v164_v24 }
  0x84   :  { %v1921_v28 = vunpack.i.h.bf16 %v1919_v20  ;;  %v1920_v30 = vunpack.i.l.bf16 %v1919_v20  ;;  %vm70_vm3 = vcmp.lt.s32.totalorder %v2293_v33, 16 }
  0x85   :  { %vm2355_vm12 = vmand %vm2218_vm6, %vm70_vm3 }
  0x86   :  { %v163_v34 = vsel %vm159_vm10, %v1921_v28, %v1926_v11  ;;  %v162_v36 = vsel %vm159_vm10, %v1920_v30, %v1925_v17  ;;  %v1934_v37 = vpop.permute.xlu1 %1933  ;;  %v167_v39 = vsel %vm159_vm10, %v1926_v11, %v1921_v28  ;;  %1757 = vmatpush1.bf16.msk.msra.mxu0 %vm1749_vm13, %v1756_v32  ;;  %v166_v43 = vsel %vm159_vm10, %v1925_v17, %v1920_v30  ;;  %vm1770_vm10 = vmpackc.low %vm2322_vm2, %vm2322_vm2 }
  0x87   :  { %v1936_v40 = vunpack.i.h.bf16 %v1934_v37  ;;  %v1935_v41 = vunpack.i.l.bf16 %v1934_v37  ;;  %v1929_v42 = vpop.permute.xlu0 %1928  ;;  %v1765_v45 = vpack.c.bf16 %v163_v34, %v162_v36  ;;  %1760 = vmatprep.subr.msk.bf16.mxu0 %vm1758_vm14, %v1759_v26  ;;  %v1768_v51 = vpack.c.bf16 %v167_v39, %v166_v43  ;;  %vm1773_vm6 = vmpackc.low %vm2355_vm12, %vm2355_vm12 }
  0x88   :  { %v1931_v46 = vunpack.i.h.bf16 %v1929_v42  ;;  %v1930_v47 = vunpack.i.l.bf16 %v1929_v42  ;;  %vm38_vm13 = vcmp.ge.s32.totalorder %v2198_v22, 0  ;;  %vm388_vm12 = vcmp.lt.s32.totalorder %v2192_v19, 127 }
  0x8a   :  { %v228_v48 = vsel %vm226_vm15, %v1931_v46, %v1936_v40  ;;  %v227_v49 = vsel %vm226_vm15, %v1930_v47, %v1935_v41  ;;  %v1944_v50 = vpop.permute.xlu1 %1943  ;;  %v232_v52 = vsel %vm226_vm15, %v1936_v40, %v1931_v46  ;;  %1763 = vmatpush1.bf16.msk.msra.mxu0 %vm1761_vm1, %v1762_v38  ;;  %v231_v56 = vsel %vm226_vm15, %v1935_v41, %v1930_v47 }
  0x8b   :  { %v1946_v53 = vunpack.i.h.bf16 %v1944_v50  ;;  %v1945_v54 = vunpack.i.l.bf16 %v1944_v50  ;;  %v1939_v55 = vpop.permute.xlu0 %1938  ;;  %v1771_v57 = vpack.c.bf16 %v228_v48, %v227_v49  ;;  %1766 = vmatprep.subr.msk.bf16.mxu0 %vm1758_vm14, %v1765_v45  ;;  %vm40_vm14 = vcmp.lt.s32.totalorder %v2198_v22, 16 }
  0x8c   :  { %v1941_v58 = vunpack.i.h.bf16 %v1939_v55  ;;  %v1940_v59 = vunpack.i.l.bf16 %v1939_v55  ;;  %v1774_v7 = vpack.c.bf16 %v232_v52, %v231_v56 }
  0x8e   :  { %v230_v62 = vsel %vm226_vm15, %v1941_v58, %v1946_v53  ;;  %v229_v31 = vsel %vm226_vm15, %v1940_v59, %v1945_v54  ;;  %v1954_v63 = vpop.permute.xlu1 %1953  ;;  %v234_v10 = vsel %vm226_vm15, %v1946_v53, %v1941_v58  ;;  %1769 = vmatpush1.bf16.msk.msra.mxu0 %vm1761_vm1, %v1768_v51  ;;  %v233_v24 = vsel %vm226_vm15, %v1945_v54, %v1940_v59  ;;  %vm2394_vm1 = vmand %vm2367_vm4, %vm55_vm5 }
  0x8f   :  { %v1956_v11 = vunpack.i.h.bf16 %v1954_v63  ;;  %v1955_v17 = vunpack.i.l.bf16 %v1954_v63  ;;  %v1949_v20 = vpop.permute.xlu0 %1948  ;;  %v1777_v26 = vpack.c.bf16 %v230_v62, %v229_v31  ;;  %1772 = vmatprep.subr.msk.bf16.mxu0 %vm1770_vm10, %v1771_v57  ;;  %vm2406_vm15 = vmand %vm38_vm13, %vm40_vm14  ;;  %v1780_v38 = vpack.c.bf16 %v234_v10, %v233_v24 }
  0x90   :  { %v1951_v28 = vunpack.i.h.bf16 %v1949_v20  ;;  %v1950_v30 = vunpack.i.l.bf16 %v1949_v20  ;;  %vm1782_vm8 = vmpackc.low %vm2394_vm1, %vm2394_vm1  ;;  %v2440_v51 = vshrl.u32 %v23_v18, 7  ;;  %v2101_v18 = vmov 839922192  }
  0x91   :  { %vm2431_vm9 = vmand %vm2406_vm15, %vm54_vm7  ;;  %v645_v57 = vunpack.c.l.s4 %v2101_v18  ;;  %v45_v62 = vadd.s32 1, %v2195_v21  ;;  %v44_v63 = vadd.s32 1, %v2198_v22 }
  0x92   :  { %v295_v32 = vsel %vm2911_vm11, %v1951_v28, %v1956_v11  ;;  %v294_v34 = vsel %vm2911_vm11, %v1950_v30, %v1955_v17  ;;  %v1964_v36 = vpop.permute.xlu1 %1963  ;;  %v299_v39 = vsel %vm2911_vm11, %v1956_v11, %v1951_v28  ;;  %1775 = vmatpush1.bf16.msk.msra.mxu0 %vm1773_vm6, %v1774_v7  ;;  %v298_v43 = vsel %vm2911_vm11, %v1955_v17, %v1950_v30  ;;  %vm1785_vm2 = vmpackc.low %vm2431_vm9, %vm2431_vm9  ;;  %v2068_v30 = vld [vmem:[%s2908_s1 + $0x7c] ss:$12 sps:$4 sm:$0xff]  }
  0x93   :  { %v1966_v40 = vunpack.i.h.bf16 %v1964_v36  ;;  %v1965_v41 = vunpack.i.l.bf16 %v1964_v36  ;;  %v1959_v42 = vpop.permute.xlu0 %1958  ;;  %v1783_v45 = vpack.c.bf16 %v295_v32, %v294_v34  ;;  %1778 = vmatprep.subr.msk.bf16.mxu0 %vm1770_vm10, %v1777_v26  ;;  %v1786_v52 = vpack.c.bf16 %v299_v39, %v298_v43  ;;  %vm2489_vm13 = vmand %vm2367_vm4, %vm71_vm0  ;;  %v2048_v43 = vld [vmem:[%s2908_s1] ss:$12 sps:$4 sm:$0xff]  }
  0x94   :  { %v1961_v46 = vunpack.i.h.bf16 %v1959_v42  ;;  %v1960_v47 = vunpack.i.l.bf16 %v1959_v42  ;;  %vm640_vm10 = vcmp.eq.s32.totalorder %v2440_v51, 0  ;;  %v646_v31 = vunpack.c.0.s8 %v645_v57  ;;  %vm1794_vm4 = vmpackc.low %vm2489_vm13, %vm2489_vm13 }
  0x95   :  { %v2102_v7 = vmov 0.0   ;;  %vm47_vm14 = vcmp.ge.s32.totalorder %v45_v62, 0  ;;  %vm46_vm1 = vcmp.ge.s32.totalorder %v44_v63, 0  ;;  %vm2521_vm9 = vmand %vm2406_vm15, %vm70_vm3 }
  0x96   :  { %v297_v49 = vsel %vm2911_vm11, %v1961_v46, %v1966_v40  ;;  %v296_v44 = vsel %vm2911_vm11, %v1960_v47, %v1965_v41  ;;  %v1974_v50 = vpop.permute.xlu1 %1973  ;;  %1781 = vmatpush1.bf16.msk.msra.mxu0 %vm1773_vm6, %v1780_v38  ;;  %v301_v54 = vsel %vm2911_vm11, %v1966_v40, %v1961_v46  ;;  %v300_v55 = vsel %vm2911_vm11, %v1965_v41, %v1960_v47 }
  0x97   :  { %v1969_v53 = vpop.permute.xlu0 %1968  ;;  %v1789_v56 = vpack.c.bf16 %v297_v49, %v296_v44  ;;  %1784 = vmatprep.subr.msk.bf16.mxu0 %vm1782_vm8, %v1783_v45  ;;  %v1792_v59 = vpack.c.bf16 %v301_v54, %v300_v55  ;;  %v641_v10 = vsel %vm640_vm10, 1.0, %v2102_v7  ;;  %v1976_v11 = vunpack.i.h.bf16 %v1974_v50 }
  0x98   :  { %v1975_v17 = vunpack.i.l.bf16 %v1974_v50  ;;  %v1971_v20 = vunpack.i.h.bf16 %v1969_v53  ;;  %v1970_v24 = vunpack.i.l.bf16 %v1969_v53  ;;  %vm49_vm6 = vcmp.lt.s32.totalorder %v45_v62, 16 }
  0x99   :  { %v642_v35 = vpack.c.bf16 %v641_v10, %v641_v10  ;;  %v649_v32 = vsub.s32 %v646_v31, %v2440_v51  ;;  %vm2531_vm10 = vmand %vm47_vm14, %vm49_vm6  ;;  %vm589_vm11 = vcmp.lt.s32.totalorder %v2192_v19, 111 }
  0x9a   :  { %v2459_v58 = vpop.permute.xlu1 %1983  ;;  %1787 = vmatpush1.bf16.msk.msra.mxu0 %vm1785_vm2, %v1786_v52  ;;  %v394_v3 = vsel %vm388_vm12, %v1976_v11, %v1971_v20  ;;  %v393_v40 = vsel %vm388_vm12, %v1975_v17, %v1970_v24  ;;  %v390_v8 = vsel %vm388_vm12, %v1971_v20, %v1976_v11  ;;  %v389_v9 = vsel %vm388_vm12, %v1970_v24, %v1975_v17  ;;  %vm1797_vm14 = vmpackc.low %vm2521_vm9, %vm2521_vm9 }
  0x9b   :  { %v1979_v61 = vpop.permute.xlu0 %1978  ;;  %1790 = vmatprep.subr.msk.bf16.mxu0 %vm1782_vm8, %v1789_v56  ;;  %v1986_v34 = vunpack.i.h.bf16 %v2459_v58  ;;  %v1985_v36 = vunpack.i.l.bf16 %v2459_v58  ;;  %vm48_vm8 = vcmp.lt.s32.totalorder %v44_v63, 16  ;;  %v1795_v4 = vpack.c.bf16 %v394_v3, %v393_v40  ;;  %vm2562_vm6 = vmand %vm2531_vm10, %vm71_vm0 }
  0x9c   :  { %v1981_v38 = vunpack.i.h.bf16 %v1979_v61  ;;  %v1980_v39 = vunpack.i.l.bf16 %v1979_v61  ;;  %vm2540_vm15 = vmand %vm46_vm1, %vm48_vm8  ;;  %v2544_v5 = vrot.slane %v642_v35, %v649_v32  ;;  %v1798_v6 = vpack.c.bf16 %v390_v8, %v389_v9 }
  0x9d   :  { %vm2577_vm0 = vmand %vm2540_vm15, %vm70_vm3 }
  0x9e   :  { %v2475_v26 = vpop.permute.xlu1 %1993  ;;  %1793 = vmatpush1.bf16.msk.msra.mxu0 %vm1785_vm2, %v1792_v59  ;;  %vm455_vm2 = vcmp.lt.s32.totalorder %v2192_v19, 113  ;;  %v395_v37 = vsel %vm388_vm12, %v1985_v36, %v1980_v39  ;;  %v391_v54 = vsel %vm388_vm12, %v1980_v39, %v1985_v36  ;;  %vm2589_vm1 = vmand %vm2531_vm10, %vm55_vm5  ;;  %v1653_v8 = vcombine.high %v2544_v5, %v2544_v5 }
  0x9f   :  { %v2483_v28 = vpop.permute.xlu0 %1988  ;;  %1090 = vmatprep.subr.bf16.mxu0 %v1727_v12  ;;  %v1996_v45 = vunpack.i.h.bf16 %v2475_v26  ;;  %v1995_v46 = vunpack.i.l.bf16 %v2475_v26  ;;  %vm1830_vm3 = vmpackc.low %vm2562_vm6, %vm2562_vm6  ;;  %v1652_v9 = vcombine.low %v2544_v5, %v2544_v5  ;;  %vm1447_vm6 = vcmp.eq.s32.totalorder %v2204_v25, 0 }
  0xa0   :  { %v1991_v48 = vunpack.i.h.bf16 %v2483_v28  ;;  %v1990_v49 = vunpack.i.l.bf16 %v2483_v28  ;;  %vm1833_vm5 = vmpackc.low %vm2577_vm0, %vm2577_vm0  ;;  %vm1448_vm0 = vcmp.eq.s32.totalorder %v2200_v23, 0 }
  0xa1   :  { %vm1806_vm8 = vmpackc.low %vm2589_vm1, %vm2589_vm1  ;;  %vm2948_vm1 = vcmp.lt.s32.totalorder %v2192_v19, 1 }
  0xa2   :  { %v2503_v41 = vpop.permute.xlu1 %2003  ;;  %1091 = vmatpush1.bf16.msra.mxu0 %v1726_v13  ;;  %v396_v13 = vsel %vm388_vm12, %v1986_v34, %v1981_v38  ;;  %v461_v31 = vsel %vm455_vm2, %v1996_v45, %v1991_v48  ;;  %v460_v63 = vsel %vm455_vm2, %v1995_v46, %v1990_v49  ;;  %v457_v24 = vsel %vm455_vm2, %v1991_v48, %v1996_v45  ;;  %vm2641_vm13 = vmand %vm2540_vm15, %vm54_vm7 }
  0xa3   :  { %v2515_v12 = vpop.permute.xlu0 %1998  ;;  %1092 = vmatprep.subr.bf16.mxu0 %v1729_v14  ;;  %v392_v14 = vsel %vm388_vm12, %v1981_v38, %v1986_v34  ;;  %v1801_v55 = vpack.c.bf16 %v396_v13, %v395_v37  ;;  %v2006_v60 = vunpack.i.h.bf16 %v2503_v41  ;;  %v2005_v56 = vunpack.i.l.bf16 %v2503_v41  ;;  %vm1809_vm7 = vmpackc.low %vm2641_vm13, %vm2641_vm13 }
  0xa4   :  { %v2001_v18 = vunpack.i.h.bf16 %v2515_v12  ;;  %v2000_v57 = vunpack.i.l.bf16 %v2515_v12  ;;  %v1804_v20 = vpack.c.bf16 %v392_v14, %v391_v54  ;;  %v456_v26 = vsel %vm455_vm2, %v1990_v49, %v1995_v46  ;;  %vm1818_vm9 = vmpackc.low %vm2531_vm10, %vm2531_vm10 }
  0xa5   :  { %v1807_v36 = vpack.c.bf16 %v461_v31, %v460_v63  ;;  %v1810_v12 = vpack.c.bf16 %v457_v24, %v456_v26  ;;  %v2052_v63 = vld [vmem:[%s2908_s1 + $0x1c] ss:$12 sps:$4 sm:$0xff]   ;;  %v2060_v24 = vld [vmem:[%s2908_s1 + $0x4c] ss:$12 sps:$4 sm:$0xff]   ;;  %vm1375_vm10 = vcmask 64512   ;;  %vm1511_vm13 = vcmask 1040384  }
  0xa6   :  { %v2014_v47 = vpop.permute.xlu1 %2013  ;;  %1093 = vmatpush1.bf16.msra.mxu0 %v1728_v15  ;;  %v463_v38 = vsel %vm455_vm2, %v2006_v60, %v2001_v18  ;;  %v462_v39 = vsel %vm455_vm2, %v2005_v56, %v2000_v57  ;;  %v458_v37 = vsel %vm455_vm2, %v2000_v57, %v2005_v56  ;;  %v2059_v26 = vld [vmem:[%s2908_s1 + $0x50] ss:$12 sps:$4 sm:$0xff]  }
  0xa7   :  { %v2016_v44 = vunpack.i.h.bf16 %v2014_v47  ;;  %v2015_v50 = vunpack.i.l.bf16 %v2014_v47  ;;  %v2009_v52 = vpop.permute.xlu0 %2008  ;;  %1796 = vmatprep.subr.msk.bf16.mxu0 %vm1794_vm4, %v1795_v4  ;;  %v459_v4 = vsel %vm455_vm2, %v2001_v18, %v2006_v60  ;;  %v1813_v5 = vpack.c.bf16 %v463_v38, %v462_v39  ;;  %vm1821_vm2 = vmpackc.low %vm2540_vm15, %vm2540_vm15  ;;  %v2070_v38 = vld [vmem:[%s2908_s1 + $0x78] ss:$12 sps:$4 sm:$0xff]   ;;  %v2072_v39 = vld [vmem:[%s2908_s1 + $0x94] ss:$12 sps:$4 sm:$0xff]  }
  0xa8   :  { %v2011_v0 = vunpack.i.h.bf16 %v2009_v52  ;;  %v2010_v1 = vunpack.i.l.bf16 %v2009_v52  ;;  %v1816_v60 = vpack.c.bf16 %v459_v4, %v458_v37  ;;  %v2080_v4 = vld [vmem:[%s2908_s1 + $0xc8] ss:$0 sps:$4 sm:$0xff]   ;;  %vm1442_vm15 = vcmp.lt.s32.totalorder %v2440_v51, 2 }
  0xaa   :  { %v2593_v58 = vpop.permute.xlu1 %2023  ;;  %v594_v59 = vsel %vm589_vm11, %v2015_v50, %v2010_v1  ;;  %v595_v61 = vsel %vm589_vm11, %v2016_v44, %v2011_v0  ;;  %v590_v27 = vsel %vm589_vm11, %v2010_v1, %v2015_v50  ;;  %v591_v62 = vsel %vm589_vm11, %v2011_v0, %v2016_v44  ;;  %1799 = vmatpush1.bf16.msk.msra.mxu0 %vm1797_vm14, %v1798_v6 }
  0xab   :  { %v2019_v10 = vpop.permute.xlu0 %2018  ;;  %v1831_v11 = vpack.c.bf16 %v595_v61, %v594_v59  ;;  %v1834_v17 = vpack.c.bf16 %v591_v62, %v590_v27  ;;  %1802 = vmatprep.subr.msk.bf16.mxu0 %vm1794_vm4, %v1801_v55  ;;  %v2026_v28 = vunpack.i.h.bf16 %v2593_v58  ;;  %v2025_v35 = vunpack.i.l.bf16 %v2593_v58  ;;  %v2047_v62 = vld [vmem:[%s2908_s1 + $0x8] ss:$12 sps:$4 sm:$0xff]  }
  0xac   :  { %v2021_v32 = vunpack.i.h.bf16 %v2019_v10  ;;  %v2020_v34 = vunpack.i.l.bf16 %v2019_v10  ;;  %vm522_vm4 = vcmp.lt.s32.totalorder %v2192_v19, 112  ;;  %v2051_v10 = vld [vmem:[%s2908_s1 + $0x20] ss:$12 sps:$4 sm:$0xff]  }
  0xad   :  { %1832 = vmatprep.subr.msk.bf16.mxu1 %vm1830_vm3, %v1831_v11  ;;  %v2056_v11 = vld [vmem:[%s2908_s1 + $0x34] ss:$12 sps:$4 sm:$0xff]  }
  0xae   :  { %v2034_v3 = vpop.permute.xlu1 %2033  ;;  %1835 = vmatpush1.bf16.msk.msra.mxu1 %vm1833_vm5, %v1834_v17  ;;  %1805 = vmatpush1.bf16.msk.msra.mxu0 %vm1797_vm14, %v1804_v20  ;;  %v528_v6 = vsel %vm522_vm4, %v2026_v28, %v2021_v32  ;;  %v527_v14 = vsel %vm522_vm4, %v2025_v35, %v2020_v34  ;;  %v524_v56 = vsel %vm522_vm4, %v2021_v32, %v2026_v28  ;;  %vm1039_vm14 = vcmask 326656   ;;  %v2055_v17 = vld [vmem:[%s2908_s1 + $0x38] ss:$12 sps:$4 sm:$0xff]   ;;  %v2058_v20 = vld [vmem:[%s2908_s1 + $0x30] ss:$12 sps:$4 sm:$0xff]  }
  0xaf   :  { %v2036_v29 = vunpack.i.h.bf16 %v2034_v3  ;;  %v2035_v40 = vunpack.i.l.bf16 %v2034_v3  ;;  %v2029_v41 = vpop.permute.xlu0 %2028  ;;  %1808 = vmatprep.subr.msk.bf16.mxu0 %vm1806_vm8, %v1807_v36  ;;  %v523_v18 = vsel %vm522_vm4, %v2020_v34, %v2025_v35  ;;  %v1819_v57 = vpack.c.bf16 %v528_v6, %v527_v14  ;;  %v2062_v28 = vld [vmem:[%s2908_s1 + $0x48] ss:$12 sps:$4 sm:$0xff]   ;;  %v2064_v35 = vld [vmem:[%s2908_s1 + $0x64] ss:$12 sps:$4 sm:$0xff]   ;;  %v2066_v34 = vld [vmem:[%s2908_s1 + $0x60] ss:$12 sps:$4 sm:$0xff]  }
  0xb0   :  { %v2031_v42 = vunpack.i.h.bf16 %v2029_v41  ;;  %v2030_v13 = vunpack.i.l.bf16 %v2029_v41  ;;  %v1822_v15 = vpack.c.bf16 %v524_v56, %v523_v18  ;;  %v2063_v32 = vld [vmem:[%s2908_s1 + $0x68] ss:$12 sps:$4 sm:$0xff]   ;;  %v2067_v36 = vld [vmem:[%s2908_s1 + $0x80] ss:$12 sps:$4 sm:$0xff]   ;;  %v2071_v3 = vld [vmem:[%s2908_s1 + $0x98] ss:$12 sps:$4 sm:$0xff]  }
  0xb1   :  { %v2075_v41 = vld [vmem:[%s2908_s1 + $0xb0] ss:$12 sps:$4 sm:$0xff]  }
  0xb2   :  { %v593_v45 = vsel %vm589_vm11, %v2031_v42, %v2036_v29  ;;  %v597_v46 = vsel %vm589_vm11, %v2036_v29, %v2031_v42  ;;  %v592_v47 = vsel %vm589_vm11, %v2030_v13, %v2035_v40  ;;  %v596_v48 = vsel %vm589_vm11, %v2035_v40, %v2030_v13  ;;  %v2044_v49 = vpop.permute.xlu1 %2043  ;;  %1811 = vmatpush1.bf16.msk.msra.mxu0 %vm1809_vm7, %v1810_v12  ;;  %v2074_v29 = vld [vmem:[%s2908_s1 + $0x90] ss:$12 sps:$4 sm:$0xff]   ;;  %v2076_v40 = vld [vmem:[%s2908_s1 + $0xac] ss:$12 sps:$4 sm:$0xff]   ;;  %v2838_v13 = vld [vmem:[%s2909_s2] sm:$0xff] }
  0xb3   :  { %v1837_v44 = vpack.c.bf16 %v597_v46, %v596_v48  ;;  %v1840_v50 = vpack.c.bf16 %v593_v45, %v592_v47  ;;  %v2046_v52 = vunpack.i.h.bf16 %v2044_v49  ;;  %v2045_v54 = vunpack.i.l.bf16 %v2044_v49  ;;  %v2039_v55 = vpop.permute.xlu0 %2038  ;;  %1814 = vmatprep.subr.msk.bf16.mxu0 %vm1806_vm8, %v1813_v5 }
  0xb4   :  { %v2041_v0 = vunpack.i.h.bf16 %v2039_v55  ;;  %v2040_v1 = vunpack.i.l.bf16 %v2039_v55  ;;  %vm1067_vm11 = vcmask 1043456   ;;  %v1665_v37 = vcombine.high %v2838_v13, %v2838_v13 }
  0xb5   :  { %1838 = vmatprep.subr.msk.bf16.mxu1 %vm1830_vm3, %v1837_v44  ;;  %v1069_v53 = vsel %vm1067_vm11, %v1652_v9, 0  ;;  %v2078_v9 = vld [vmem:[%s2908_s1 + $0xa8] ss:$12 sps:$4 sm:$0xff]   ;;  %vm2949_vm3 = vmmov %vm2948_vm1  ;;  %vm1464_vm8 = vcmp.eq.s32.totalorder %v2200_v23, 15 }
  0xb6   :  { %v530_v33 = vsel %vm522_vm4, %v2046_v52, %v2041_v0  ;;  %v529_v58 = vsel %vm522_vm4, %v2045_v54, %v2040_v1  ;;  %1841 = vmatpush1.bf16.msk.msra.mxu1 %vm1833_vm5, %v1840_v50  ;;  %1817 = vmatpush1.bf16.msk.msra.mxu0 %vm1809_vm7, %v1816_v60  ;;  %v526_v59 = vsel %vm522_vm4, %v2041_v0, %v2046_v52  ;;  %vm1463_vm5 = vcmp.eq.s32.totalorder %v2204_v25, 15 }
  0xb7   :  { %1654 = vmatprep.subr.msk.bf16.mxu1 %vm1067_vm11, %v1653_v8  ;;  %v525_v61 = vsel %vm522_vm4, %v2040_v1, %v2045_v54  ;;  %v1825_v27 = vpack.c.bf16 %v530_v33, %v529_v58  ;;  %1820 = vmatprep.subr.msk.bf16.mxu0 %vm1818_vm9, %v1819_v57  ;;  %v685_v8 = vld [vmem:[%s2908_s1 + $0xc0] sm:$0xff] }
  0xb8   :  { %v1828_v31 = vpack.c.bf16 %v526_v59, %v525_v61  ;;  %v1614_v12 = vcombine.high %v685_v8, %v685_v8  ;;  %v1613_v42 = vcombine.low %v685_v8, %v685_v8 }
  0xba   :  { %1200 = vmatpush1.bf16.msra.mxu1 %v1069_v53  ;;  %1823 = vmatpush1.bf16.msk.msra.mxu0 %vm1821_vm2, %v1822_v15 }
  0xbb   :  { %1826 = vmatprep.subr.msk.bf16.mxu0 %vm1818_vm9, %v1825_v27 }
  0xbd   :  { %1655 = vmatmul.mubr.msk.bf16.vlgmr.msra.gmra.mrb[0].mxu1 %vm1039_vm14, %v2047_v62 }
  0xbe   :  { %1237 = vmatprep.mubr.bf16.mxu1 %v2100_v16  ;;  %1829 = vmatpush1.bf16.msk.msra.mxu0 %vm1821_vm2, %v1828_v31 }
  0xc1   :  { %1107 = vmatmul.mubr.bf16.vlgmr.msra.gmra.mrb[0].mxu0 %v2048_v43 }
  0xc2   :  { %1116 = vmatprep.mubr.bf16.mxu0 %v2052_v63 }
  0xc5   :  { %1656 = vmatmul.mubr.msk.bf16.gmra.mrb[4].mxu1 %vm1039_vm14, %v2051_v10 }
  0xc6   :  { %1247 = vmatprep.mubr.bf16.mxu1 %v2100_v16 }
  0xc9   :  { %1117 = vmatmul.mubr.bf16.gmra.mrb[4].mxu0 %v2054_v2 }
  0xca   :  { %1126 = vmatprep.mubr.bf16.mxu0 %v2056_v11 }
  0xcd   :  { %1657 = vmatmul.mubr.msk.bf16.gmra.mrb[8].mxu1 %vm1039_vm14, %v2055_v17 }
  0xce   :  { %1257 = vmatprep.mubr.bf16.mxu1 %v2100_v16 }
  0xd1   :  { %1127 = vmatmul.mubr.bf16.gmra.mrb[8].mxu0 %v2058_v20 }
  0xd2   :  { %1136 = vmatprep.mubr.bf16.mxu0 %v2060_v24 }
  0xd5   :  { %1658 = vmatmul.mubr.msk.bf16.gmra.mrb[12].mxu1 %vm1039_vm14, %v2059_v26 }
  0xd6   :  { %1267 = vmatprep.mubr.bf16.mxu1 %v2100_v16 }
  0xd9   :  { %1137 = vmatmul.mubr.bf16.gmra.mrb[12].mxu0 %v2062_v28 }
  0xda   :  { %1146 = vmatprep.mubr.bf16.mxu0 %v2064_v35 }
  0xdd   :  { %1659 = vmatmul.mubr.msk.bf16.gmra.mrb[16].mxu1 %vm1039_vm14, %v2063_v32 }
  0xde   :  { %1277 = vmatprep.mubr.bf16.mxu1 %v2100_v16 }
  0xe1   :  { %1147 = vmatmul.mubr.bf16.gmra.mrb[16].mxu0 %v2066_v34 }
  0xe2   :  { %1156 = vmatprep.mubr.bf16.mxu0 %v2068_v30 }
  0xe5   :  { %1660 = vmatmul.mubr.msk.bf16.gmra.mrb[20].mxu1 %vm1039_vm14, %v2067_v36 }
  0xe6   :  { %1287 = vmatprep.mubr.bf16.mxu1 %v2100_v16 }
  0xe9   :  { %1157 = vmatmul.mubr.bf16.gmra.mrb[20].mxu0 %v2070_v38 }
  0xea   :  { %1166 = vmatprep.mubr.bf16.mxu0 %v2072_v39 }
  0xed   :  { %1661 = vmatmul.mubr.msk.bf16.gmra.mrb[24].mxu1 %vm1039_vm14, %v2071_v3 }
  0xee   :  { %1297 = vmatprep.mubr.bf16.mxu1 %v2100_v16 }
  0xf1   :  { %1167 = vmatmul.mubr.bf16.gmra.mrb[24].mxu0 %v2074_v29 }
  0xf2   :  { %1176 = vmatprep.mubr.bf16.mxu0 %v2076_v40 }
  0xf5   :  { %1662 = vmatmul.mubr.msk.bf16.gmra.mrb[28].mxu1 %vm1039_vm14, %v2075_v41 }
  0xf6   :  { %1307 = vmatprep.mubr.bf16.mxu1 %v2100_v16 }
  0xf9   :  { %1177 = vmatmul.mubr.bf16.gmra.mrb[28].mxu0 %v2078_v9 }
  0xfa   :  { %1186 = vmatprep.mubr.bf16.mxu0 %v1614_v12 }
  0xfd   :  { %1663 = vmatmul.mubr.msk.bf16.gmra.mrb[32].mxu1 %vm1039_vm14, %v2080_v4 }
  0xfe   :  { %1667 = vmatprep.mubr.msk.bf16.mxu1 %vm1375_vm10, %v1665_v37 }
 0x101   :  { %1187 = vmatmul.mubr.bf16.gmra.mrb[32].mxu0 %v1613_v42 }
 0x190   :  { %v1229_v5 = vpop.f32.mrb[0].mxu1 }
 0x191   :  { %v1231_v6 = vpop.f32.mrb[1].mxu1 }
 0x192   :  { %v1233_v14 = vpop.f32.mrb[2].mxu1 }
 0x193   :  { %v1235_v45 = vpop.f32.mrb[3].mxu1 }
 0x194   :  { %v1108_v46 = vpop.f32.mrb[0].mxu0 }
 0x195   :  { %v1230_v47 = vadd.f32 %v1229_v5, %v1108_v46  ;;  %v1110_v48 = vpop.f32.mrb[1].mxu0 }
 0x196   :  { %v1232_v49 = vadd.f32 %v1231_v6, %v1110_v48  ;;  %v1112_v44 = vpop.f32.mrb[2].mxu0 }
 0x197   :  { %v1234_v50 = vadd.f32 %v1233_v14, %v1112_v44  ;;  %v1114_v52 = vpop.f32.mrb[3].mxu0  ;;  %v1316_v1 = vmax.f32 %v1230_v47, 0.0 }
 0x198   :  { %v1239_v54 = vpop.f32.mrb[4].mxu1  ;;  %v1236_v55 = vadd.f32 %v1235_v45, %v1114_v52  ;;  %v1317_v18 = vmax.f32 %v1232_v49, 0.0 }
 0x199   :  { %v1241_v0 = vpop.f32.mrb[5].mxu1  ;;  %v1318_v60 = vmax.f32 %v1234_v50, 0.0 }
 0x19a   :  { %v1243_v56 = vpop.f32.mrb[6].mxu1  ;;  %v1319_v57 = vmax.f32 %v1236_v55, 0.0 }
 0x19b   :  { %v1245_v33 = vpop.f32.mrb[7].mxu1  ;;  %v1350_v58 = vpack.c.bf16 %v1318_v60, %v1316_v1 }
 0x19c   :  { %v1351_v53 = vpack.c.bf16 %v1319_v57, %v1317_v18  ;;  %v1118_v59 = vpop.f32.mrb[4].mxu0 }
 0x19d   :  { %v1240_v61 = vadd.f32 %v1239_v54, %v1118_v59  ;;  %v1120_v27 = vpop.f32.mrb[5].mxu0 }
 0x19e   :  { %v1242_v15 = vadd.f32 %v1241_v0, %v1120_v27  ;;  %v1122_v62 = vpop.f32.mrb[6].mxu0  ;;  %1385 = vmatprep.subr.bf16.mxu1 %v1351_v53 }
 0x19f   :  { %v1244_v31 = vadd.f32 %v1243_v56, %v1122_v62  ;;  %v1124_v43 = vpop.f32.mrb[7].mxu0  ;;  %1386 = vmatpush1.bf16.msra.mxu1 %v1350_v58  ;;  %v1320_v11 = vmax.f32 %v1240_v61, 0.0 }
 0x1a0   :  { %v1249_v63 = vpop.f32.mrb[8].mxu1  ;;  %v1246_v10 = vadd.f32 %v1245_v33, %v1124_v43  ;;  %v1321_v24 = vmax.f32 %v1242_v15, 0.0 }
 0x1a1   :  { %v1251_v2 = vpop.f32.mrb[9].mxu1  ;;  %v1322_v17 = vmax.f32 %v1244_v31, 0.0 }
 0x1a2   :  { %v1253_v20 = vpop.f32.mrb[10].mxu1  ;;  %v1323_v26 = vmax.f32 %v1246_v10, 0.0 }
 0x1a3   :  { %v1255_v28 = vpop.f32.mrb[11].mxu1  ;;  %v1352_v35 = vpack.c.bf16 %v1322_v17, %v1320_v11 }
 0x1a4   :  { %v1353_v32 = vpack.c.bf16 %v1323_v26, %v1321_v24  ;;  %v1128_v34 = vpop.f32.mrb[8].mxu0 }
 0x1a5   :  { %v1250_v30 = vadd.f32 %v1249_v63, %v1128_v34  ;;  %v1130_v36 = vpop.f32.mrb[9].mxu0 }
 0x1a6   :  { %v1252_v38 = vadd.f32 %v1251_v2, %v1130_v36  ;;  %v1132_v39 = vpop.f32.mrb[10].mxu0  ;;  %1387 = vmatprep.subr.bf16.mxu1 %v1353_v32 }
 0x1a7   :  { %v1254_v3 = vadd.f32 %v1253_v20, %v1132_v39  ;;  %v1134_v29 = vpop.f32.mrb[11].mxu0  ;;  %1388 = vmatpush1.bf16.msra.mxu1 %v1352_v35  ;;  %v1324_v9 = vmax.f32 %v1250_v30, 0.0 }
 0x1a8   :  { %v1259_v40 = vpop.f32.mrb[12].mxu1  ;;  %v1256_v41 = vadd.f32 %v1255_v28, %v1134_v29  ;;  %v1325_v42 = vmax.f32 %v1252_v38, 0.0 }
 0x1a9   :  { %v1261_v8 = vpop.f32.mrb[13].mxu1  ;;  %v1326_v12 = vmax.f32 %v1254_v3, 0.0 }
 0x1aa   :  { %v1263_v4 = vpop.f32.mrb[14].mxu1  ;;  %v1327_v37 = vmax.f32 %v1256_v41, 0.0 }
 0x1ab   :  { %v1265_v5 = vpop.f32.mrb[15].mxu1  ;;  %v1354_v6 = vpack.c.bf16 %v1326_v12, %v1324_v9 }
 0x1ac   :  { %v1355_v14 = vpack.c.bf16 %v1327_v37, %v1325_v42  ;;  %v1138_v45 = vpop.f32.mrb[12].mxu0 }
 0x1ad   :  { %v1260_v46 = vadd.f32 %v1259_v40, %v1138_v45  ;;  %v1140_v47 = vpop.f32.mrb[13].mxu0 }
 0x1ae   :  { %v1262_v48 = vadd.f32 %v1261_v8, %v1140_v47  ;;  %v1142_v49 = vpop.f32.mrb[14].mxu0  ;;  %1389 = vmatprep.subr.bf16.mxu1 %v1355_v14 }
 0x1af   :  { %v1264_v44 = vadd.f32 %v1263_v4, %v1142_v49  ;;  %v1144_v50 = vpop.f32.mrb[15].mxu0  ;;  %1390 = vmatpush1.bf16.msra.mxu1 %v1354_v6  ;;  %v1328_v0 = vmax.f32 %v1260_v46, 0.0 }
 0x1b0   :  { %v1269_v52 = vpop.f32.mrb[16].mxu1  ;;  %v1266_v54 = vadd.f32 %v1265_v5, %v1144_v50  ;;  %v1329_v56 = vmax.f32 %v1262_v48, 0.0 }
 0x1b1   :  { %v1271_v55 = vpop.f32.mrb[17].mxu1  ;;  %v1330_v1 = vmax.f32 %v1264_v44, 0.0 }
 0x1b2   :  { %v1273_v60 = vpop.f32.mrb[18].mxu1  ;;  %v1331_v18 = vmax.f32 %v1266_v54, 0.0 }
 0x1b3   :  { %v1275_v57 = vpop.f32.mrb[19].mxu1  ;;  %v1356_v33 = vpack.c.bf16 %v1330_v1, %v1328_v0 }
 0x1b4   :  { %v1357_v58 = vpack.c.bf16 %v1331_v18, %v1329_v56  ;;  %v1148_v53 = vpop.f32.mrb[16].mxu0 }
 0x1b5   :  { %v1270_v59 = vadd.f32 %v1269_v52, %v1148_v53  ;;  %v1150_v61 = vpop.f32.mrb[17].mxu0 }
 0x1b6   :  { %v1272_v27 = vadd.f32 %v1271_v55, %v1150_v61  ;;  %v1152_v15 = vpop.f32.mrb[18].mxu0  ;;  %1391 = vmatprep.subr.bf16.mxu1 %v1357_v58 }
 0x1b7   :  { %v1274_v62 = vadd.f32 %v1273_v60, %v1152_v15  ;;  %v1154_v31 = vpop.f32.mrb[19].mxu0  ;;  %1392 = vmatpush1.bf16.msra.mxu1 %v1356_v33  ;;  %v1332_v2 = vmax.f32 %v1270_v59, 0.0 }
 0x1b8   :  { %v1279_v43 = vpop.f32.mrb[20].mxu1  ;;  %v1276_v63 = vadd.f32 %v1275_v57, %v1154_v31  ;;  %v1333_v20 = vmax.f32 %v1272_v27, 0.0 }
 0x1b9   :  { %v1281_v10 = vpop.f32.mrb[21].mxu1  ;;  %v1334_v11 = vmax.f32 %v1274_v62, 0.0 }
 0x1ba   :  { %v1283_v17 = vpop.f32.mrb[22].mxu1  ;;  %v1335_v24 = vmax.f32 %v1276_v63, 0.0 }
 0x1bb   :  { %v1285_v26 = vpop.f32.mrb[23].mxu1  ;;  %v1358_v28 = vpack.c.bf16 %v1334_v11, %v1332_v2 }
 0x1bc   :  { %v1359_v35 = vpack.c.bf16 %v1335_v24, %v1333_v20  ;;  %v1158_v32 = vpop.f32.mrb[20].mxu0 }
 0x1bd   :  { %v1280_v34 = vadd.f32 %v1279_v43, %v1158_v32  ;;  %v1160_v30 = vpop.f32.mrb[21].mxu0 }
 0x1be   :  { %v1282_v36 = vadd.f32 %v1281_v10, %v1160_v30  ;;  %v1162_v38 = vpop.f32.mrb[22].mxu0  ;;  %1393 = vmatprep.subr.bf16.mxu1 %v1359_v35 }
 0x1bf   :  { %v1284_v39 = vadd.f32 %v1283_v17, %v1162_v38  ;;  %v1164_v3 = vpop.f32.mrb[23].mxu0  ;;  %1394 = vmatpush1.bf16.msra.mxu1 %v1358_v28  ;;  %v1336_v8 = vmax.f32 %v1280_v34, 0.0 }
 0x1c0   :  { %v1289_v29 = vpop.f32.mrb[24].mxu1  ;;  %v1286_v40 = vadd.f32 %v1285_v26, %v1164_v3  ;;  %v1337_v4 = vmax.f32 %v1282_v36, 0.0 }
 0x1c1   :  { %v1291_v41 = vpop.f32.mrb[25].mxu1  ;;  %v1338_v9 = vmax.f32 %v1284_v39, 0.0 }
 0x1c2   :  { %v1293_v12 = vpop.f32.mrb[26].mxu1  ;;  %v1339_v42 = vmax.f32 %v1286_v40, 0.0 }
 0x1c3   :  { %v1295_v37 = vpop.f32.mrb[27].mxu1  ;;  %v1360_v5 = vpack.c.bf16 %v1338_v9, %v1336_v8  ;;  %v1664_v8 = vcombine.low %v2838_v13, %v2838_v13 }
 0x1c4   :  { %v1361_v6 = vpack.c.bf16 %v1339_v42, %v1337_v4  ;;  %v1168_v14 = vpop.f32.mrb[24].mxu0 }
 0x1c5   :  { %v1290_v45 = vadd.f32 %v1289_v29, %v1168_v14  ;;  %v1170_v46 = vpop.f32.mrb[25].mxu0 }
 0x1c6   :  { %v1292_v47 = vadd.f32 %v1291_v41, %v1170_v46  ;;  %v1172_v48 = vpop.f32.mrb[26].mxu0  ;;  %1395 = vmatprep.subr.bf16.mxu1 %v1361_v6 }
 0x1c7   :  { %v1294_v49 = vadd.f32 %v1293_v12, %v1172_v48  ;;  %v1174_v44 = vpop.f32.mrb[27].mxu0  ;;  %1396 = vmatpush1.bf16.msra.mxu1 %v1360_v5  ;;  %v1340_v55 = vmax.f32 %v1290_v45, 0.0 }
 0x1c8   :  { %v1299_v50 = vpop.f32.mrb[28].mxu1  ;;  %v1296_v52 = vadd.f32 %v1295_v37, %v1174_v44  ;;  %v1341_v60 = vmax.f32 %v1292_v47, 0.0 }
 0x1c9   :  { %v1301_v54 = vpop.f32.mrb[29].mxu1  ;;  %v1342_v0 = vmax.f32 %v1294_v49, 0.0 }
 0x1ca   :  { %v1303_v1 = vpop.f32.mrb[30].mxu1  ;;  %v1343_v56 = vmax.f32 %v1296_v52, 0.0 }
 0x1cb   :  { %v1305_v18 = vpop.f32.mrb[31].mxu1  ;;  %v1362_v57 = vpack.c.bf16 %v1342_v0, %v1340_v55 }
 0x1cc   :  { %v1363_v33 = vpack.c.bf16 %v1343_v56, %v1341_v60  ;;  %v1178_v58 = vpop.f32.mrb[28].mxu0 }
 0x1cd   :  { %v1300_v53 = vadd.f32 %v1299_v50, %v1178_v58  ;;  %v1180_v59 = vpop.f32.mrb[29].mxu0 }
 0x1ce   :  { %v1302_v61 = vadd.f32 %v1301_v54, %v1180_v59  ;;  %v1182_v27 = vpop.f32.mrb[30].mxu0  ;;  %1397 = vmatprep.subr.bf16.mxu1 %v1363_v33 }
 0x1cf   :  { %v1304_v15 = vadd.f32 %v1303_v1, %v1182_v27  ;;  %v1184_v62 = vpop.f32.mrb[31].mxu0  ;;  %1398 = vmatpush1.bf16.msra.mxu1 %v1362_v57  ;;  %v1344_v10 = vmax.f32 %v1300_v53, 0.0 }
 0x1d0   :  { %v1309_v31 = vpop.f32.mrb[32].mxu1  ;;  %v1306_v43 = vadd.f32 %v1305_v18, %v1184_v62  ;;  %v1345_v17 = vmax.f32 %v1302_v61, 0.0 }
 0x1d1   :  { %v1311_v63 = vpop.f32.mrb[33].mxu1  ;;  %v1346_v2 = vmax.f32 %v1304_v15, 0.0 }
 0x1d2   :  { %v1313_v11 = vpop.f32.mrb[34].mxu1  ;;  %v1347_v20 = vmax.f32 %v1306_v43, 0.0  ;;  %v1509_v43 = vcvt.s32.f32 %v2198_v22 }
 0x1d3   :  { %v1314_v24 = vpop.f32.mrb[35].mxu1  ;;  %v1364_v26 = vpack.c.bf16 %v1346_v2, %v1344_v10  ;;  %v1510_v10 = vcvt.s32.f32 %v2195_v21 }
 0x1d4   :  { %v1365_v28 = vpack.c.bf16 %v1347_v20, %v1345_v17  ;;  %v1188_v35 = vpop.f32.mrb[32].mxu0 }
 0x1d5   :  { %v1310_v32 = vadd.f32 %v1309_v31, %v1188_v35  ;;  %v1190_v34 = vpop.f32.mrb[33].mxu0  ;;  %v1507_v31 = vcvt.s32.f32 %v2204_v25 }
 0x1d6   :  { %v1312_v30 = vadd.f32 %v1311_v63, %v1190_v34  ;;  %v1192_v36 = vpop.f32.mrb[34].mxu0  ;;  %1399 = vmatprep.subr.bf16.mxu1 %v1365_v28  ;;  %v1508_v63 = vcvt.s32.f32 %v2200_v23 }
 0x1d7   :  { %v1348_v38 = vmax.f32 %v1310_v32, 0.0  ;;  %v1193_v39 = vpop.f32.mrb[35].mxu0  ;;  %1400 = vmatpush1.bf16.msra.mxu1 %v1364_v26  ;;  %v1512_v19 = vsel %vm1511_vm13, %v1507_v31, %v1509_v43 }
 0x1d8   :  { %v1349_v3 = vmax.f32 %v1312_v30, 0.0  ;;  %v1513_v25 = vsel %vm1511_vm13, %v1508_v63, %v1510_v10 }
 0x1d9   :  { %v1366_v29 = vpack.c.bf16 %v1348_v38, %v1348_v38 }
 0x1da   :  { %v1367_v40 = vpack.c.bf16 %v1349_v3, %v1349_v3 }
 0x1db   :  { %v1380_v41 = vsel %vm1067_vm11, %v1366_v29, 0 }
 0x1dc   :  { %1666 = vmatprep.subr.msk.bf16.mxu1 %vm1067_vm11, %v1367_v40  ;;  %vm1517_vm11 = vcmask 1042432  }
 0x1dd   :  { %1402 = vmatpush1.bf16.msra.mxu1 %v1380_v41 }
 0x1e0   :  { %1418 = vmatmul.mubr.bf16.vlgmr.msra.gmra.mrb[36].mxu1 %v1664_v8 }
 0x2b3   :  { %v1419_v9 = vpop.f32.mrb[36].mxu1 }
 0x2b4   :  { %v1668_v12 = vmul.f32 -1.442695, %v1419_v9  ;;  %v1421_v4 = vpop.f32.mrb[37].mxu1 }
 0x2b5   :  { %v1669_v42 = vmul.f32 -1.442695, %v1421_v4  ;;  %v1423_v37 = vpop.f32.mrb[38].mxu1 }
 0x2b6   :  { %2084 = vpow2.f32 %v1668_v12  ;;  %v1424_v5 = vpop.f32.mrb[39].mxu1 }
 0x2b7   :  { %2086 = vpow2.f32 %v1669_v42 }
 0x2c0   :  { %v2085_v6 = vpop.eup %2084 }
 0x2c1   :  { %v2087_v14 = vpop.eup %2086  ;;  %v1432_v45 = vadd.f32 1.0, %v2085_v6 }
 0x2c2   :  { %v1433_v46 = vadd.f32 1.0, %v2087_v14 }
 0x2c3   :  { %2088 = vrcp.f32 %v1432_v45 }
 0x2c4   :  { %2090 = vrcp.f32 %v1433_v46 }
 0x2cd   :  { %v2089_v47 = vpop.eup %2088 }
 0x2ce   :  { %v2091_v48 = vpop.eup %2090  ;;  %v1438_v49 = vmax.f32 %v2089_v47, 0.0001 }
 0x2cf   :  { %v1439_v13 = vmax.f32 %v2091_v48, 0.0001 }
 0x2d0   :  { %v1440_v44 = vmin.f32 %v1438_v49, 0.9999 }
 0x2d1   :  { %v1441_v50 = vmin.f32 %v1439_v13, 0.9999 }
 0x2d2   :  { %v2847_v52 = vsel %vm1442_vm15, %v1440_v44, %v1419_v9 }
 0x2d3   :  { %1445 = vst [vmem:[%s2910_s3] sm:$0xff] %v2847_v52  ;;  %v2853_v54 = vsel %vm1442_vm15, %v1441_v50, %v1421_v4  ;;  %v1451_v55 = vrot.slane %v2847_v52, 1  ;;  %vm1491_vm14 = vcmp.lt.f32.partialorder %v2847_v52, 1.0 }
 0x2d4   :  { %1446 = vst [vmem:[%s2910_s3 + $0x8] sm:$0xff] %v2853_v54  ;;  %v1452_v51 = vrot.slane %v2853_v54, 1 }
 0x2d5   :  { %1455 = vrot.lane.b32.xlu0 %v1451_v55, %s2095_s0 }
 0x2d6   :  { %1457 = vrot.lane.b32.xlu1 %v1452_v51, %s2095_s0 }
 0x2d9   :  { %1465 = vrot.lane.b32.xlu0 %v1451_v55, %s2096_s4 }
 0x2da   :  { %1467 = vrot.lane.b32.xlu1 %v1452_v51, %s2096_s4 }
 0x347   :  { %v1456_v0 = vpop.permute.xlu0 %1455 }
 0x348   :  { %v1458_v1 = vpop.permute.xlu1 %1457 }
 0x349   :  { %v1459_v60 = vsel %vm2948_vm1, %v1456_v0, %v1458_v1  ;;  %v1460_v56 = vsel %vm2949_vm3, %v1458_v1, %v1456_v0  ;;  %vm1544_vm3 = vcmask 1045504  }
 0x34a   :  { %v1461_v53 = vsel %vm1447_vm6, -inf, %v1460_v56  ;;  %v1462_v59 = vsel %vm1448_vm0, -inf, %v1459_v60  ;;  %vm1492_vm6 = vcmp.lt.f32.partialorder %v2853_v54, 1.0 }
 0x34b   :  { %v1466_v18 = vpop.permute.xlu0 %1465 }
 0x34c   :  { %v1468_v57 = vpop.permute.xlu1 %1467 }
 0x34d   :  { %v1469_v33 = vsel %vm388_vm12, %v1466_v18, %v1468_v57  ;;  %v1470_v58 = vsel %vm388_vm12, %v1468_v57, %v1466_v18  ;;  %vm1514_vm12 = vcmask 1041408  }
 0x34e   :  { %v1471_v61 = vsel %vm1463_vm5, -inf, %v1469_v33  ;;  %v1472_v27 = vsel %vm1464_vm8, -inf, %v1470_v58  ;;  %v1515_v26 = vsel %vm1514_vm12, %v1512_v19, %v1507_v31  ;;  %v1516_v28 = vsel %vm1514_vm12, %v1513_v25, %v1508_v63 }
 0x34f   :  { %v1473_v15 = vmax.f32 %v1461_v53, %v1471_v61  ;;  %v1474_v62 = vmax.f32 %v1462_v59, %v1472_v27  ;;  %v1518_v35 = vsel %vm1517_vm11, %v1515_v26, %v1509_v43  ;;  %v1519_v30 = vsel %vm1517_vm11, %v1516_v28, %v1510_v10 }
 0x350   :  { %v1522_v39 = vrot.slane %v1518_v35, 6  ;;  %v1523_v3 = vrot.slane %v1519_v30, 6 }
 0x351   :  { %v1475_v2 = vmax.f32 %v1473_v15, %v1451_v55  ;;  %v1476_v11 = vmax.f32 %v1474_v62, %v1452_v51 }
 0x352   :  { %v1527_v4 = vadd.f32 %v1523_v3, %v2853_v54 }
 0x353   :  { %vm1477_vm4 = vcmp.eq.f32.partialorder %v1475_v2, %v1451_v55  ;;  %vm1478_vm7 = vcmp.eq.f32.partialorder %v1476_v11, %v1452_v51 }
 0x354   :  { %v1670_v17 = vsel %vm1477_vm4, 1.0, %v2102_v7  ;;  %v1671_v20 = vsel %vm1478_vm7, 1.0, %v2102_v7 }
 0x355   :  { %v1485_v24 = vrot.slane %v1670_v17, 7  ;;  %v1486_v22 = vrot.slane %v1671_v20, 7 }
 0x357   :  { %v1489_v21 = vmul.f32 %v1485_v24, %v2847_v52  ;;  %v1490_v23 = vmul.f32 %v1486_v22, %v2853_v54 }
 0x359   :  { %vm1493_vm9 = vcmp.gt.f32.partialorder %v1489_v21, 0.4  ;;  %vm1494_vm2 = vcmp.gt.f32.partialorder %v1490_v23, 0.4  ;;  %v1530_v41 = vrot.slane %v1489_v21, 1  ;;  %v1531_v9 = vrot.slane %v1490_v23, 1 }
 0x35a   :  { %v1495_v32 = vsel %vm1493_vm9, 1, %v2100_v16  ;;  %v1496_v34 = vsel %vm1494_vm2, 1, %v2100_v16  ;;  %v1526_v16 = vadd.f32 %v1522_v39, %v2847_v52 }
 0x35b   :  { %v1497_v36 = vrot.slane %v1495_v32, 6  ;;  %v1498_v38 = vrot.slane %v1496_v34, 6 }
 0x35d   :  { %vm1499_vm10 = vcmp.ne.s32.totalorder %v1497_v36, 0  ;;  %vm1500_vm15 = vcmp.ne.s32.totalorder %v1498_v38, 0 }
 0x35e   :  { %vm1501_vm0 = vmand %vm1491_vm14, %vm1499_vm10 }
 0x35f   :  { %vm1502_vm1 = vmand %vm1492_vm6, %vm1500_vm15  ;;  %v1672_v29 = vsel %vm1501_vm0, 1.0, %v2102_v7 }
 0x360   :  { %v1673_v40 = vsel %vm1502_vm1, 1.0, %v2102_v7  ;;  %v1536_v8 = vrot.slane %v1672_v29, 2 }
 0x361   :  { %v1537_v12 = vrot.slane %v1673_v40, 2 }
 0x362   :  { %v1540_v42 = vsel %vm1511_vm13, %v1530_v41, %v1536_v8 }
 0x363   :  { %v1541_v37 = vsel %vm1511_vm13, %v1531_v9, %v1537_v12  ;;  %v1542_v5 = vsel %vm1514_vm12, %v1540_v42, %v1526_v16 }
 0x364   :  { %v1543_v6 = vsel %vm1514_vm12, %v1541_v37, %v1527_v4  ;;  %v1545_v14 = vsel %vm1544_vm3, %v1542_v5, 0.0 }
 0x365   :  { %v1546_v45 = vsel %vm1544_vm3, %v1543_v6, 0.0  ;;  %1547 = vst [vmem:[%s2910_s3 + $0x10] sm:$0xff] %v1545_v14 }
 0x366   :  { %1548 = vst [vmem:[%s2910_s3 + $0x18] sm:$0xff] %v1546_v45 }

</bundles_post_ra>
